<compile_context>
chip_gen: v7x
topology: tpu7x:2x2x1
jax: 0.10.0
libtpu: 0.0.40
codegen_flags: <defaults>
</compile_context>

<pallas_src>
import functools

import numpy as np
import jax
import jax.numpy as jnp
from jax import lax
from jax.experimental import pallas as pl
from jax.experimental.pallas import tpu as pltpu

LANE = 128


def _round_up(x, m):
    return (x + m - 1) // m * m


def _vmem_limit_bytes():
    """Generation-aware scoped-VMEM limit (~75% of physical, <= 100 MiB).

    ~96 MiB on v5e/v6e (128 MiB physical), ~48 MiB on v7x (64 MiB physical).
    Falls back to 48 MiB, which is safe on every generation.
    """
    cap = 64 * 1024 * 1024
    try:
        cap = int(getattr(pltpu.get_tpu_info(), "vmem_capacity_bytes", cap))
    except Exception:
        pass
    return int(min(cap * 3 // 4, 100 * 1024 * 1024))


def _pick_stripe_rows(Ho, Wp, P_p, stride, vmem_limit):
    """Output-row-stripe height TH, sized from the VMEM budget.

    Bigger stripes amortize the 2-row stage-1 halo recompute (2/(TH+2)) and
    the ~0.35us per-grid-step overhead, and enlarge the matmul M dim (target
    TH*Wo >= 256 to fill the 256-deep MXU on v6e/v7x).  Capped at 64 rows and
    ~1/4 of the VMEM limit for the expanded-intermediate scratch.
    """
    budget = max(vmem_limit // 4, 1)
    th = 1
    for cand in range(1, min(Ho, 64) + 1):
        th_in = (cand - 1) * stride + 3
        if th_in * Wp * P_p * 4 <= budget:
            th = cand
    return th


# ------------------------------ fused kernel --------------------------------


def _block_kernel(x_ref, w1_ref, s1_ref, b1_ref,
                  w2_ref, s2_ref, b2_ref,
                  w3_ref, s3_ref, b3_ref,
                  *rest,
                  stride, TH, H, W, Wo, shortcut, mxu_dtype):
    """One (batch element, output-row-stripe) tile of the inverted residual.

    x_ref : (1, Hp, Wp, Cin)  spatially padded input (real channel count),
            resident in VMEM across the stripe axis (index_map ignores s).
    rest  : ([ws_ref, ss_ref, bs_ref,] o_ref, t1_ref)
    t1_ref: (TH_in, Wp, P_p) VMEM scratch -- the lane-padded expanded
            intermediate, never written to HBM.
    o_ref : (1, TH, Wo, Cout) output stripe (real channel count).
    """
    if shortcut == "conv":
        ws_ref, ss_ref, bs_ref, o_ref, t1_ref = rest
    else:
        o_ref, t1_ref = rest

    Wp = x_ref.shape[2]
    Cin = x_ref.shape[3]
    P_p = w1_ref.shape[1]

    s = pl.program_id(1)
    TH_in = (TH - 1) * stride + 3
    r0 = s * (TH * stride)
    if (TH * stride) % 8 == 0:
        r0 = pl.multiple_of(r0, 8)

    # ---------------- stage 1: 1x1 expansion conv + BN + ReLU ----------------
    xw = x_ref[0, pl.ds(r0, TH_in), :, :]                 # (TH_in, Wp, Cin)
    x2 = xw.reshape(TH_in * Wp, Cin).astype(mxu_dtype)
    t1 = jnp.dot(x2, w1_ref[...],                         # weights pre-cast
                 preferred_element_type=jnp.float32)
    t1 = jnp.maximum(t1 * s1_ref[...] + b1_ref[...], 0.0)
    t1 = t1.reshape(TH_in, Wp, P_p)

    # In-kernel halo handling: positions corresponding to conv2's zero padding
    # must be literal zeros (not relu(bn1(0))), so mask them out.  Rows past
    # the image (last, overhanging stripe) are masked too; their outputs are
    # discarded by Pallas' non-divisible-block handling.
    row = lax.broadcasted_iota(jnp.int32, (TH_in, Wp, 1), 0) + r0
    col = lax.broadcasted_iota(jnp.int32, (TH_in, Wp, 1), 1)
    valid = (row >= 1) & (row <= H) & (col >= 1) & (col <= W)
    t1_ref[...] = jnp.where(valid, t1, 0.0)

    # --------------- stage 2: depthwise 3x3 conv + BN + ReLU -----------------
    w2 = w2_ref[...]                                      # (3, 3, P_p)
    acc = jnp.zeros((TH, Wo, P_p), jnp.float32)
    for kh in range(3):
        for kw in range(3):
            if stride == 1:
                patch = t1_ref[pl.ds(kh, TH), pl.ds(kw, Wo), :]
            else:
                patch = t1_ref[pl.ds(kh, (TH - 1) * stride + 1),
                               pl.ds(kw, (Wo - 1) * stride + 1), :]
                patch = patch[::stride, ::stride, :]
            acc = acc + patch * w2[kh:kh + 1, kw:kw + 1, :]
    t2 = jnp.maximum(acc * s2_ref[...] + b2_ref[...], 0.0)

    # ------------- stage 3: 1x1 projection conv + BN (+ residual) ------------
    t2m = t2.reshape(TH * Wo, P_p).astype(mxu_dtype)
    out = jnp.dot(t2m, w3_ref[...], preferred_element_type=jnp.float32)
    out = out * s3_ref[...] + b3_ref[...]

    if shortcut != "none":                                 # stride == 1 only
        xres = x_ref[0, pl.ds(r0 + 1, TH), pl.ds(1, W), :]  # (TH, W, Cin)
        xres = xres.reshape(TH * W, Cin)
        if shortcut == "identity":
            out = out + xres                               # f32 add
        else:  # fused shortcut 1x1 conv + BN
            res = jnp.dot(xres.astype(mxu_dtype), ws_ref[...],
                          preferred_element_type=jnp.float32)
            out = out + (res * ss_ref[...] + bs_ref[...])

    o_ref[...] = out.reshape(o_ref.shape).astype(o_ref.dtype)


# --------------------------- parameters & wrapper ---------------------------


def _fold_bn(bn, eps=1e-5):
    gamma, beta, mean, var = bn
    scale = gamma / jnp.sqrt(var + eps)
    bias = beta - mean * scale
    return scale, bias


def _pad_axis(a, target, axis):
    pad = [(0, 0)] * a.ndim
    pad[axis] = (0, target - a.shape[axis])
    return jnp.pad(a, pad)


def init_block_params(key, in_planes, out_planes, expansion, stride):
    planes = expansion * in_planes
    keys = jax.random.split(key, 8)

    def conv_w(k, shape, fan_in):
        return (jax.random.normal(k, shape, jnp.float32)
                * (1.0 / np.sqrt(fan_in))).astype(jnp.float32)

    def bn_params(k, c):
        k1, k2, k3, k4 = jax.random.split(k, 4)
        gamma = 1.0 + 0.1 * jax.random.normal(k1, (c,), jnp.float32)
        beta = 0.1 * jax.random.normal(k2, (c,), jnp.float32)
        mean = 0.1 * jax.random.normal(k3, (c,), jnp.float32)
        var = 1.0 + 0.1 * jax.random.uniform(k4, (c,), jnp.float32)
        return gamma, beta, mean, var

    params = {
        "w1": conv_w(keys[0], (in_planes, planes), in_planes),   # 1x1 (Cin,Cout)
        "bn1": bn_params(keys[1], planes),
        "w2": conv_w(keys[2], (3, 3, planes), 9),                # depthwise
        "bn2": bn_params(keys[3], planes),
        "w3": conv_w(keys[4], (planes, out_planes), planes),     # 1x1
        "bn3": bn_params(keys[5], out_planes),
    }
    if stride == 1 and in_planes != out_planes:
        params["ws"] = conv_w(keys[6], (in_planes, out_planes), in_planes)
        params["bns"] = bn_params(keys[7], out_planes)
    return params


def block_forward_nhwc(params, x_nhwc, in_planes, out_planes, expansion,
                       stride, mxu_dtype=jnp.bfloat16):
    """NHWC in / NHWC out. Whole block = one fused pallas_call."""
    N, H, W, Cin = x_nhwc.shape
    assert Cin == in_planes
    planes = expansion * in_planes
    Ho = (H - 1) // stride + 1          # 3x3, pad=1
    Wo = (W - 1) // stride + 1
    Wp = _round_up(W + 2, 8)            # sublane-aligned padded width
    P_p = _round_up(planes, LANE)       # expanded intermediate is lane-dense

    vmem_limit = _vmem_limit_bytes()
    TH = _pick_stripe_rows(Ho, Wp, P_p, stride, vmem_limit)
    TH_in = (TH - 1) * stride + 3
    n_stripes = -(-Ho // TH)            # cdiv: TH need not divide Ho
    # Pad H so the (possibly overhanging) last stripe's input reads stay in
    # bounds; outputs past Ho are masked out by Pallas.
    Hp = max(H + 2, (n_stripes - 1) * TH * stride + TH_in)

    s1, b1 = _fold_bn(params["bn1"])
    s2, b2 = _fold_bn(params["bn2"])
    s3, b3 = _fold_bn(params["bn3"])

    # Spatial halo pad only (W rounded to a multiple of 8); real channel count
    # is preserved in HBM -- no channel padding.
    x = jnp.pad(x_nhwc, ((0, 0), (1, Hp - (H + 1)), (1, Wp - (W + 1)), (0, 0)))

    # Weights: pad only the expanded-channel dim (MXU K/N for the in-VMEM
    # intermediate) and pre-cast MXU operands to bf16 in the wrapper.
    w1 = _pad_axis(params["w1"], P_p, 1).astype(mxu_dtype)   # (Cin, P_p)
    w2 = _pad_axis(params["w2"], P_p, 2)                     # (3, 3, P_p) f32
    w3 = _pad_axis(params["w3"], P_p, 0).astype(mxu_dtype)   # (P_p, Cout)
    s1p = _pad_axis(s1.reshape(1, -1), P_p, 1)
    b1p = _pad_axis(b1.reshape(1, -1), P_p, 1)
    s2p = _pad_axis(s2.reshape(1, 1, -1), P_p, 2)
    b2p = _pad_axis(b2.reshape(1, 1, -1), P_p, 2)
    s3p = s3.reshape(1, -1)
    b3p = b3.reshape(1, -1)

    if stride == 1:
        shortcut = "identity" if in_planes == out_planes else "conv"
    else:
        shortcut = "none"

    inputs = [x, w1, s1p, b1p, w2, s2p, b2p, w3, s3p, b3p]
    in_specs = [
        # input image block: resident across the stripe axis (index ignores s)
        pl.BlockSpec((1, Hp, Wp, Cin), lambda n, s: (n, 0, 0, 0)),
        # weights / folded-BN params stay resident in VMEM
        pl.BlockSpec((Cin, P_p), lambda n, s: (0, 0)),
        pl.BlockSpec((1, P_p), lambda n, s: (0, 0)),
        pl.BlockSpec((1, P_p), lambda n, s: (0, 0)),
        pl.BlockSpec((3, 3, P_p), lambda n, s: (0, 0, 0)),
        pl.BlockSpec((1, 1, P_p), lambda n, s: (0, 0, 0)),
        pl.BlockSpec((1, 1, P_p), lambda n, s: (0, 0, 0)),
        pl.BlockSpec((P_p, out_planes), lambda n, s: (0, 0)),
        pl.BlockSpec((1, out_planes), lambda n, s: (0, 0)),
        pl.BlockSpec((1, out_planes), lambda n, s: (0, 0)),
    ]
    if shortcut == "conv":
        ss, bs = _fold_bn(params["bns"])
        ws = params["ws"].astype(mxu_dtype)                  # (Cin, Cout)
        inputs += [ws, ss.reshape(1, -1), bs.reshape(1, -1)]
        in_specs += [pl.BlockSpec((Cin, out_planes), lambda n, s: (0, 0)),
                     pl.BlockSpec((1, out_planes), lambda n, s: (0, 0)),
                     pl.BlockSpec((1, out_planes), lambda n, s: (0, 0))]

    kernel = functools.partial(_block_kernel, stride=stride, TH=TH, H=H, W=W,
                               Wo=Wo, shortcut=shortcut, mxu_dtype=mxu_dtype)

    # Advisory cost estimate on REAL (unpadded) shapes.
    flops = (2 * N * H * W * in_planes * planes       # expansion 1x1
             + 2 * N * Ho * Wo * 9 * planes           # depthwise 3x3
             + 2 * N * Ho * Wo * planes * out_planes)  # projection 1x1
    if shortcut == "conv":
        flops += 2 * N * Ho * Wo * in_planes * out_planes
    bytes_accessed = int(sum(int(np.prod(a.shape)) * a.dtype.itemsize
                             for a in inputs)
                         + N * Ho * Wo * out_planes * 4)

    y = pl.pallas_call(
        kernel,
        out_shape=jax.ShapeDtypeStruct((N, Ho, Wo, out_planes), x_nhwc.dtype),
        grid_spec=pltpu.PrefetchScalarGridSpec(
            num_scalar_prefetch=0,
            grid=(N, n_stripes),
            in_specs=in_specs,
            out_specs=pl.BlockSpec((1, TH, Wo, out_planes),
                                   lambda n, s: (n, s, 0, 0)),
            scratch_shapes=[pltpu.VMEM((TH_in, Wp, P_p), jnp.float32)],
        ),
        compiler_params=pltpu.CompilerParams(
            # Both axes are independent (disjoint output stripes, no carry),
            # so v7x's two TensorCores can split stripes even at batch 1.
            dimension_semantics=("parallel", "parallel"),
            vmem_limit_bytes=vmem_limit,
        ),
        cost_estimate=pl.CostEstimate(flops=flops, transcendentals=0,
                                      bytes_accessed=bytes_accessed),
    )(*inputs)
    return y


def block_forward(params, x_nchw, in_planes, out_planes, expansion, stride,
                  mxu_dtype=jnp.bfloat16):
    """NCHW in / NCHW out, matching the PyTorch module's layout.

    The transposes exist only at this interface; when stacking blocks keep
    activations NHWC and call block_forward_nhwc directly (perf review).
    """
    x = jnp.transpose(x_nchw, (0, 2, 3, 1))
    y = block_forward_nhwc(params, x, in_planes, out_planes, expansion,
                           stride, mxu_dtype=mxu_dtype)
    return jnp.transpose(y, (0, 3, 1, 2))


# ----------------------------- pure-JAX reference ----------------------------


def reference_forward(params, x_nchw, in_planes, out_planes, expansion, stride):
    eps = 1e-5
    planes = expansion * in_planes

    def bn_apply(x, bn):
        gamma, beta, mean, var = bn
        scale = gamma / jnp.sqrt(var + eps)
        bias = beta - mean * scale
        return x * scale[None, :, None, None] + bias[None, :, None, None]

    dn = ("NCHW", "OIHW", "NCHW")
    w1 = jnp.transpose(params["w1"], (1, 0))[:, :, None, None]
    out = lax.conv_general_dilated(x_nchw, w1, (1, 1), "VALID",
                                   dimension_numbers=dn)
    out = jax.nn.relu(bn_apply(out, params["bn1"]))

    w2 = jnp.transpose(params["w2"], (2, 0, 1))[:, None, :, :]
    out = lax.conv_general_dilated(out, w2, (stride, stride),
                                   ((1, 1), (1, 1)), dimension_numbers=dn,
                                   feature_group_count=planes)
    out = jax.nn.relu(bn_apply(out, params["bn2"]))

    w3 = jnp.transpose(params["w3"], (1, 0))[:, :, None, None]
    out = lax.conv_general_dilated(out, w3, (1, 1), "VALID",
                                   dimension_numbers=dn)
    out = bn_apply(out, params["bn3"])

    if stride == 1:
        if in_planes != out_planes:
            ws = jnp.transpose(params["ws"], (1, 0))[:, :, None, None]
            sc = lax.conv_general_dilated(x_nchw, ws, (1, 1), "VALID",
                                          dimension_numbers=dn)
            sc = bn_apply(sc, params["bns"])
        else:
            sc = x_nchw
        out = out + sc
    return out


# ----------------------------------- main ------------------------------------


if __name__ == "__main__":
    key = jax.random.PRNGKey(0)

    # Config 1: stride 1, in != out -> fused shortcut 1x1 conv + BN.
    in_planes, out_planes, expansion, stride = 4, 8, 6, 1
    kx, kp, key = jax.random.split(key, 3)
    x = jax.random.normal(kx, (2, in_planes, 16, 16), dtype=jnp.float32)
    params = init_block_params(kp, in_planes, out_planes, expansion, stride)
    y = jax.block_until_ready(
        block_forward(params, x, in_planes, out_planes, expansion, stride))
    ref = jax.block_until_ready(
        reference_forward(params, x, in_planes, out_planes, expansion, stride))
    assert y.shape == ref.shape == (2, out_planes, 16, 16)
    # bf16 MXU inputs (f32 accumulation) -> bf16-appropriate tolerance.
    np.testing.assert_allclose(np.asarray(y), np.asarray(ref),
                               rtol=5e-2, atol=5e-2)

    # Config 2: stride 1, in == out -> identity residual.
    in_planes, out_planes, expansion, stride = 8, 8, 4, 1
    kx, kp, key = jax.random.split(key, 3)
    x = jax.random.normal(kx, (2, in_planes, 16, 16), dtype=jnp.float32)
    params = init_block_params(kp, in_planes, out_planes, expansion, stride)
    y = jax.block_until_ready(
        block_forward(params, x, in_planes, out_planes, expansion, stride))
    ref = jax.block_until_ready(
        reference_forward(params, x, in_planes, out_planes, expansion, stride))
    assert y.shape == ref.shape == (2, out_planes, 16, 16)
    np.testing.assert_allclose(np.asarray(y), np.asarray(ref),
                               rtol=5e-2, atol=5e-2)

    print("KERNEL_OK")
</pallas_src>

<mosaic_0001>
module attributes {stable_mosaic.version = 11 : i64} {
  func.func @_block_kernel(%arg0: i32, %arg1: i32, %arg2: memref<1x18x24x4xf32, #tpu.memory_space<vmem>>, %arg3: memref<4x128xbf16, #tpu.memory_space<vmem>>, %arg4: memref<1x128xf32, #tpu.memory_space<vmem>>, %arg5: memref<1x128xf32, #tpu.memory_space<vmem>>, %arg6: memref<3x3x128xf32, #tpu.memory_space<vmem>>, %arg7: memref<1x1x128xf32, #tpu.memory_space<vmem>>, %arg8: memref<1x1x128xf32, #tpu.memory_space<vmem>>, %arg9: memref<128x8xbf16, #tpu.memory_space<vmem>>, %arg10: memref<1x8xf32, #tpu.memory_space<vmem>>, %arg11: memref<1x8xf32, #tpu.memory_space<vmem>>, %arg12: memref<4x8xbf16, #tpu.memory_space<vmem>>, %arg13: memref<1x8xf32, #tpu.memory_space<vmem>>, %arg14: memref<1x8xf32, #tpu.memory_space<vmem>>, %arg15: memref<1x16x16x8xf32, #tpu.memory_space<vmem>>, %arg16: memref<18x24x128xf32, #tpu.memory_space<vmem>>) attributes {dimension_semantics = [#tpu.dimension_semantics<parallel>, #tpu.dimension_semantics<parallel>], iteration_bounds = array<i64: 2, 1>, scalar_prefetch = 0 : i64, scratch_operands = 1 : i64, tpu.core_type = #tpu.core_type<tc>, window_params = [{transform_indices = @transform_0, window_bounds = array<i64: 1, 18, 24, 4>}, {pipeline_mode = #tpu.pipeline_mode<synchronous>, transform_indices = @transform_1, window_bounds = array<i64: 4, 128>}, {pipeline_mode = #tpu.pipeline_mode<synchronous>, transform_indices = @transform_2, window_bounds = array<i64: 1, 128>}, {pipeline_mode = #tpu.pipeline_mode<synchronous>, transform_indices = @transform_3, window_bounds = array<i64: 1, 128>}, {pipeline_mode = #tpu.pipeline_mode<synchronous>, transform_indices = @transform_4, window_bounds = array<i64: 3, 3, 128>}, {pipeline_mode = #tpu.pipeline_mode<synchronous>, transform_indices = @transform_5, window_bounds = array<i64: 1, 1, 128>}, {pipeline_mode = #tpu.pipeline_mode<synchronous>, transform_indices = @transform_6, window_bounds = array<i64: 1, 1, 128>}, {pipeline_mode = #tpu.pipeline_mode<synchronous>, transform_indices = @transform_7, window_bounds = array<i64: 128, 8>}, {pipeline_mode = #tpu.pipeline_mode<synchronous>, transform_indices = @transform_8, window_bounds = array<i64: 1, 8>}, {pipeline_mode = #tpu.pipeline_mode<synchronous>, transform_indices = @transform_9, window_bounds = array<i64: 1, 8>}, {pipeline_mode = #tpu.pipeline_mode<synchronous>, transform_indices = @transform_10, window_bounds = array<i64: 4, 8>}, {pipeline_mode = #tpu.pipeline_mode<synchronous>, transform_indices = @transform_11, window_bounds = array<i64: 1, 8>}, {pipeline_mode = #tpu.pipeline_mode<synchronous>, transform_indices = @transform_12, window_bounds = array<i64: 1, 8>}, {transform_indices = @transform_13, window_bounds = array<i64: 1, 16, 16, 8>}]} {
    %c16_i32 = arith.constant 16 : i32
    %0 = arith.muli %arg1, %c16_i32 : i32
    %1 = tpu.assume_multiple %0, 8 : i32
    %c0 = arith.constant 0 : index
    %2 = arith.index_cast %1 : i32 to index
    %c0_0 = arith.constant 0 : index
    %c0_1 = arith.constant 0 : index
    %3 = vector.load %arg2[%c0, %2, %c0_0, %c0_1] : memref<1x18x24x4xf32, #tpu.memory_space<vmem>>, vector<1x18x24x4xf32>
    %4 = vector.shape_cast %3 : vector<1x18x24x4xf32> to vector<18x24x4xf32>
    %5 = vector.shape_cast %4 : vector<18x24x4xf32> to vector<432x4xf32>
    %6 = arith.truncf %5 : vector<432x4xf32> to vector<432x4xbf16>
    %c0_2 = arith.constant 0 : index
    %c0_3 = arith.constant 0 : index
    %7 = vector.load %arg3[%c0_2, %c0_3] : memref<4x128xbf16, #tpu.memory_space<vmem>>, vector<4x128xbf16>
    %cst = arith.constant dense<0.000000e+00> : vector<432x128xf32>
    %8 = tpu.matmul %6, %7, %cst {dimension_numbers = #tpu.dot_dimension_numbers<[1], [0], [0], [1], [0, 0, 1, 1], [], []>} : vector<432x4xbf16>, vector<4x128xbf16>, vector<432x128xf32> -> vector<432x128xf32>
    %c0_4 = arith.constant 0 : index
    %c0_5 = arith.constant 0 : index
    %9 = vector.load %arg4[%c0_4, %c0_5] : memref<1x128xf32, #tpu.memory_space<vmem>>, vector<1x128xf32>
    %10 = vector.broadcast %9 : vector<1x128xf32> to vector<432x128xf32>
    %11 = arith.mulf %8, %10 : vector<432x128xf32>
    %c0_6 = arith.constant 0 : index
    %c0_7 = arith.constant 0 : index
    %12 = vector.load %arg5[%c0_6, %c0_7] : memref<1x128xf32, #tpu.memory_space<vmem>>, vector<1x128xf32>
    %13 = vector.broadcast %12 : vector<1x128xf32> to vector<432x128xf32>
    %14 = arith.addf %11, %13 : vector<432x128xf32>
    %cst_8 = arith.constant 0.000000e+00 : f32
    %15 = vector.broadcast %cst_8 : f32 to vector<432x128xf32>
    %16 = arith.maximumf %14, %15 : vector<432x128xf32>
    %17 = vector.shape_cast %16 : vector<432x128xf32> to vector<18x24x128xf32>
    %18 = tpu.iota {dimensions = array<i32: 0>} : vector<18x24x1xi32>
    %19 = vector.broadcast %1 : i32 to vector<18x24x1xi32>
    %20 = arith.addi %18, %19 : vector<18x24x1xi32>
    %21 = tpu.iota {dimensions = array<i32: 1>} : vector<18x24x1xi32>
    %c1_i32 = arith.constant 1 : i32
    %22 = vector.broadcast %c1_i32 : i32 to vector<18x24x1xi32>
    %23 = arith.cmpi sge, %20, %22 : vector<18x24x1xi32>
    %c16_i32_9 = arith.constant 16 : i32
    %24 = vector.broadcast %c16_i32_9 : i32 to vector<18x24x1xi32>
    %25 = arith.cmpi sle, %20, %24 : vector<18x24x1xi32>
    %26 = arith.andi %23, %25 : vector<18x24x1xi1>
    %c1_i32_10 = arith.constant 1 : i32
    %27 = vector.broadcast %c1_i32_10 : i32 to vector<18x24x1xi32>
    %28 = arith.cmpi sge, %21, %27 : vector<18x24x1xi32>
    %29 = arith.andi %26, %28 : vector<18x24x1xi1>
    %c16_i32_11 = arith.constant 16 : i32
    %30 = vector.broadcast %c16_i32_11 : i32 to vector<18x24x1xi32>
    %31 = arith.cmpi sle, %21, %30 : vector<18x24x1xi32>
    %32 = arith.andi %29, %31 : vector<18x24x1xi1>
    %cst_12 = arith.constant 0.000000e+00 : f32
    %33 = vector.shape_cast %32 : vector<18x24x1xi1> to vector<18x24x1xi1>
    %34 = vector.broadcast %33 : vector<18x24x1xi1> to vector<18x24x128xi1>
    %35 = vector.broadcast %cst_12 : f32 to vector<18x24x128xf32>
    %36 = arith.select %34, %17, %35 : vector<18x24x128xi1>, vector<18x24x128xf32>
    %c0_13 = arith.constant 0 : index
    %c0_14 = arith.constant 0 : index
    %c0_15 = arith.constant 0 : index
    %37 = vector.load %arg16[%c0_13, %c0_14, %c0_15] : memref<18x24x128xf32, #tpu.memory_space<vmem>>, vector<18x24x128xf32>
    tpu.vector_store %arg16[%c0_13, %c0_14, %c0_15], %36 {strides = array<i32>} : memref<18x24x128xf32, #tpu.memory_space<vmem>>, vector<18x24x128xf32>,
    %c0_16 = arith.constant 0 : index
    %c0_17 = arith.constant 0 : index
    %c0_18 = arith.constant 0 : index
    %38 = vector.load %arg6[%c0_16, %c0_17, %c0_18] : memref<3x3x128xf32, #tpu.memory_space<vmem>>, vector<3x3x128xf32>
    %cst_19 = arith.constant 0.000000e+00 : f32
    %39 = vector.broadcast %cst_19 : f32 to vector<16x16x128xf32>
    %c0_20 = arith.constant 0 : index
    %c0_21 = arith.constant 0 : index
    %c0_22 = arith.constant 0 : index
    %40 = vector.load %arg16[%c0_20, %c0_21, %c0_22] : memref<18x24x128xf32, #tpu.memory_space<vmem>>, vector<16x16x128xf32>
    %41 = vector.extract_strided_slice %38 {offsets = [0, 0, 0], sizes = [1, 1, 128], strides = [1, 1, 1]} : vector<3x3x128xf32> to vector<1x1x128xf32>
    %42 = vector.broadcast %41 : vector<1x1x128xf32> to vector<16x16x128xf32>
    %43 = arith.mulf %40, %42 : vector<16x16x128xf32>
    %44 = arith.addf %39, %43 : vector<16x16x128xf32>
    %c0_23 = arith.constant 0 : index
    %c1 = arith.constant 1 : index
    %c0_24 = arith.constant 0 : index
    %45 = vector.load %arg16[%c0_23, %c1, %c0_24] : memref<18x24x128xf32, #tpu.memory_space<vmem>>, vector<16x16x128xf32>
    %46 = vector.extract_strided_slice %38 {offsets = [0, 1, 0], sizes = [1, 1, 128], strides = [1, 1, 1]} : vector<3x3x128xf32> to vector<1x1x128xf32>
    %47 = vector.broadcast %46 : vector<1x1x128xf32> to vector<16x16x128xf32>
    %48 = arith.mulf %45, %47 : vector<16x16x128xf32>
    %49 = arith.addf %44, %48 : vector<16x16x128xf32>
    %c0_25 = arith.constant 0 : index
    %c2 = arith.constant 2 : index
    %c0_26 = arith.constant 0 : index
    %50 = vector.load %arg16[%c0_25, %c2, %c0_26] : memref<18x24x128xf32, #tpu.memory_space<vmem>>, vector<16x16x128xf32>
    %51 = vector.extract_strided_slice %38 {offsets = [0, 2, 0], sizes = [1, 1, 128], strides = [1, 1, 1]} : vector<3x3x128xf32> to vector<1x1x128xf32>
    %52 = vector.broadcast %51 : vector<1x1x128xf32> to vector<16x16x128xf32>
    %53 = arith.mulf %50, %52 : vector<16x16x128xf32>
    %54 = arith.addf %49, %53 : vector<16x16x128xf32>
    %c1_27 = arith.constant 1 : index
    %c0_28 = arith.constant 0 : index
    %c0_29 = arith.constant 0 : index
    %55 = vector.load %arg16[%c1_27, %c0_28, %c0_29] : memref<18x24x128xf32, #tpu.memory_space<vmem>>, vector<16x16x128xf32>
    %56 = vector.extract_strided_slice %38 {offsets = [1, 0, 0], sizes = [1, 1, 128], strides = [1, 1, 1]} : vector<3x3x128xf32> to vector<1x1x128xf32>
    %57 = vector.broadcast %56 : vector<1x1x128xf32> to vector<16x16x128xf32>
    %58 = arith.mulf %55, %57 : vector<16x16x128xf32>
    %59 = arith.addf %54, %58 : vector<16x16x128xf32>
    %c1_30 = arith.constant 1 : index
    %c1_31 = arith.constant 1 : index
    %c0_32 = arith.constant 0 : index
    %60 = vector.load %arg16[%c1_30, %c1_31, %c0_32] : memref<18x24x128xf32, #tpu.memory_space<vmem>>, vector<16x16x128xf32>
    %61 = vector.extract_strided_slice %38 {offsets = [1, 1, 0], sizes = [1, 1, 128], strides = [1, 1, 1]} : vector<3x3x128xf32> to vector<1x1x128xf32>
    %62 = vector.broadcast %61 : vector<1x1x128xf32> to vector<16x16x128xf32>
    %63 = arith.mulf %60, %62 : vector<16x16x128xf32>
    %64 = arith.addf %59, %63 : vector<16x16x128xf32>
    %c1_33 = arith.constant 1 : index
    %c2_34 = arith.constant 2 : index
    %c0_35 = arith.constant 0 : index
    %65 = vector.load %arg16[%c1_33, %c2_34, %c0_35] : memref<18x24x128xf32, #tpu.memory_space<vmem>>, vector<16x16x128xf32>
    %66 = vector.extract_strided_slice %38 {offsets = [1, 2, 0], sizes = [1, 1, 128], strides = [1, 1, 1]} : vector<3x3x128xf32> to vector<1x1x128xf32>
    %67 = vector.broadcast %66 : vector<1x1x128xf32> to vector<16x16x128xf32>
    %68 = arith.mulf %65, %67 : vector<16x16x128xf32>
    %69 = arith.addf %64, %68 : vector<16x16x128xf32>
    %c2_36 = arith.constant 2 : index
    %c0_37 = arith.constant 0 : index
    %c0_38 = arith.constant 0 : index
    %70 = vector.load %arg16[%c2_36, %c0_37, %c0_38] : memref<18x24x128xf32, #tpu.memory_space<vmem>>, vector<16x16x128xf32>
    %71 = vector.extract_strided_slice %38 {offsets = [2, 0, 0], sizes = [1, 1, 128], strides = [1, 1, 1]} : vector<3x3x128xf32> to vector<1x1x128xf32>
    %72 = vector.broadcast %71 : vector<1x1x128xf32> to vector<16x16x128xf32>
    %73 = arith.mulf %70, %72 : vector<16x16x128xf32>
    %74 = arith.addf %69, %73 : vector<16x16x128xf32>
    %c2_39 = arith.constant 2 : index
    %c1_40 = arith.constant 1 : index
    %c0_41 = arith.constant 0 : index
    %75 = vector.load %arg16[%c2_39, %c1_40, %c0_41] : memref<18x24x128xf32, #tpu.memory_space<vmem>>, vector<16x16x128xf32>
    %76 = vector.extract_strided_slice %38 {offsets = [2, 1, 0], sizes = [1, 1, 128], strides = [1, 1, 1]} : vector<3x3x128xf32> to vector<1x1x128xf32>
    %77 = vector.broadcast %76 : vector<1x1x128xf32> to vector<16x16x128xf32>
    %78 = arith.mulf %75, %77 : vector<16x16x128xf32>
    %79 = arith.addf %74, %78 : vector<16x16x128xf32>
    %c2_42 = arith.constant 2 : index
    %c2_43 = arith.constant 2 : index
    %c0_44 = arith.constant 0 : index
    %80 = vector.load %arg16[%c2_42, %c2_43, %c0_44] : memref<18x24x128xf32, #tpu.memory_space<vmem>>, vector<16x16x128xf32>
    %81 = vector.extract_strided_slice %38 {offsets = [2, 2, 0], sizes = [1, 1, 128], strides = [1, 1, 1]} : vector<3x3x128xf32> to vector<1x1x128xf32>
    %82 = vector.broadcast %81 : vector<1x1x128xf32> to vector<16x16x128xf32>
    %83 = arith.mulf %80, %82 : vector<16x16x128xf32>
    %84 = arith.addf %79, %83 : vector<16x16x128xf32>
    %c0_45 = arith.constant 0 : index
    %c0_46 = arith.constant 0 : index
    %c0_47 = arith.constant 0 : index
    %85 = vector.load %arg7[%c0_45, %c0_46, %c0_47] : memref<1x1x128xf32, #tpu.memory_space<vmem>>, vector<1x1x128xf32>
    %86 = vector.broadcast %85 : vector<1x1x128xf32> to vector<16x16x128xf32>
    %87 = arith.mulf %84, %86 : vector<16x16x128xf32>
    %c0_48 = arith.constant 0 : index
    %c0_49 = arith.constant 0 : index
    %c0_50 = arith.constant 0 : index
    %88 = vector.load %arg8[%c0_48, %c0_49, %c0_50] : memref<1x1x128xf32, #tpu.memory_space<vmem>>, vector<1x1x128xf32>
    %89 = vector.broadcast %88 : vector<1x1x128xf32> to vector<16x16x128xf32>
    %90 = arith.addf %87, %89 : vector<16x16x128xf32>
    %cst_51 = arith.constant 0.000000e+00 : f32
    %91 = vector.broadcast %cst_51 : f32 to vector<16x16x128xf32>
    %92 = arith.maximumf %90, %91 : vector<16x16x128xf32>
    %93 = vector.shape_cast %92 : vector<16x16x128xf32> to vector<256x128xf32>
    %94 = arith.truncf %93 : vector<256x128xf32> to vector<256x128xbf16>
    %c0_52 = arith.constant 0 : index
    %c0_53 = arith.constant 0 : index
    %95 = vector.load %arg9[%c0_52, %c0_53] : memref<128x8xbf16, #tpu.memory_space<vmem>>, vector<128x8xbf16>
    %cst_54 = arith.constant dense<0.000000e+00> : vector<256x8xf32>
    %96 = tpu.matmul %94, %95, %cst_54 {dimension_numbers = #tpu.dot_dimension_numbers<[1], [0], [0], [1], [0, 0, 1, 1], [], []>} : vector<256x128xbf16>, vector<128x8xbf16>, vector<256x8xf32> -> vector<256x8xf32>
    %c0_55 = arith.constant 0 : index
    %c0_56 = arith.constant 0 : index
    %97 = vector.load %arg10[%c0_55, %c0_56] : memref<1x8xf32, #tpu.memory_space<vmem>>, vector<1x8xf32>
    %98 = vector.broadcast %97 : vector<1x8xf32> to vector<256x8xf32>
    %99 = arith.mulf %96, %98 : vector<256x8xf32>
    %c0_57 = arith.constant 0 : index
    %c0_58 = arith.constant 0 : index
    %100 = vector.load %arg11[%c0_57, %c0_58] : memref<1x8xf32, #tpu.memory_space<vmem>>, vector<1x8xf32>
    %101 = vector.broadcast %100 : vector<1x8xf32> to vector<256x8xf32>
    %102 = arith.addf %99, %101 : vector<256x8xf32>
    %c1_i32_59 = arith.constant 1 : i32
    %103 = arith.addi %1, %c1_i32_59 : i32
    %c0_60 = arith.constant 0 : index
    %104 = arith.index_cast %103 : i32 to index
    %c1_61 = arith.constant 1 : index
    %c0_62 = arith.constant 0 : index
    %105 = vector.load %arg2[%c0_60, %104, %c1_61, %c0_62] : memref<1x18x24x4xf32, #tpu.memory_space<vmem>>, vector<1x16x16x4xf32>
    %106 = vector.shape_cast %105 : vector<1x16x16x4xf32> to vector<16x16x4xf32>
    %107 = vector.shape_cast %106 : vector<16x16x4xf32> to vector<256x4xf32>
    %108 = arith.truncf %107 : vector<256x4xf32> to vector<256x4xbf16>
    %c0_63 = arith.constant 0 : index
    %c0_64 = arith.constant 0 : index
    %109 = vector.load %arg12[%c0_63, %c0_64] : memref<4x8xbf16, #tpu.memory_space<vmem>>, vector<4x8xbf16>
    %cst_65 = arith.constant dense<0.000000e+00> : vector<256x8xf32>
    %110 = tpu.matmul %108, %109, %cst_65 {dimension_numbers = #tpu.dot_dimension_numbers<[1], [0], [0], [1], [0, 0, 1, 1], [], []>} : vector<256x4xbf16>, vector<4x8xbf16>, vector<256x8xf32> -> vector<256x8xf32>
    %c0_66 = arith.constant 0 : index
    %c0_67 = arith.constant 0 : index
    %111 = vector.load %arg13[%c0_66, %c0_67] : memref<1x8xf32, #tpu.memory_space<vmem>>, vector<1x8xf32>
    %112 = vector.broadcast %111 : vector<1x8xf32> to vector<256x8xf32>
    %113 = arith.mulf %110, %112 : vector<256x8xf32>
    %c0_68 = arith.constant 0 : index
    %c0_69 = arith.constant 0 : index
    %114 = vector.load %arg14[%c0_68, %c0_69] : memref<1x8xf32, #tpu.memory_space<vmem>>, vector<1x8xf32>
    %115 = vector.broadcast %114 : vector<1x8xf32> to vector<256x8xf32>
    %116 = arith.addf %113, %115 : vector<256x8xf32>
    %117 = arith.addf %102, %116 : vector<256x8xf32>
    %118 = vector.shape_cast %117 : vector<256x8xf32> to vector<1x16x16x8xf32>
    %c0_70 = arith.constant 0 : index
    %c0_71 = arith.constant 0 : index
    %c0_72 = arith.constant 0 : index
    %c0_73 = arith.constant 0 : index
    %119 = vector.load %arg15[%c0_70, %c0_71, %c0_72, %c0_73] : memref<1x16x16x8xf32, #tpu.memory_space<vmem>>, vector<1x16x16x8xf32>
    tpu.vector_store %arg15[%c0_70, %c0_71, %c0_72, %c0_73], %118 {strides = array<i32>} : memref<1x16x16x8xf32, #tpu.memory_space<vmem>>, vector<1x16x16x8xf32>,
    return
  }
  func.func @transform_0(%arg0: i32, %arg1: i32) -> (i32, i32, i32, i32) {
    %c0_i32 = arith.constant 0 : i32
    %c0_i32_0 = arith.constant 0 : i32
    %c0_i32_1 = arith.constant 0 : i32
    %c0_i32_2 = arith.constant 0 : i32
    return %arg0, %c0_i32, %c0_i32_0, %c0_i32_1 : i32, i32, i32, i32
  }
  func.func @transform_1(%arg0: i32, %arg1: i32) -> (i32, i32) {
    %c0_i32 = arith.constant 0 : i32
    %c0_i32_0 = arith.constant 0 : i32
    %c0_i32_1 = arith.constant 0 : i32
    return %c0_i32, %c0_i32_0 : i32, i32
  }
  func.func @transform_2(%arg0: i32, %arg1: i32) -> (i32, i32) {
    %c0_i32 = arith.constant 0 : i32
    %c0_i32_0 = arith.constant 0 : i32
    %c0_i32_1 = arith.constant 0 : i32
    return %c0_i32, %c0_i32_0 : i32, i32
  }
  func.func @transform_3(%arg0: i32, %arg1: i32) -> (i32, i32) {
    %c0_i32 = arith.constant 0 : i32
    %c0_i32_0 = arith.constant 0 : i32
    %c0_i32_1 = arith.constant 0 : i32
    return %c0_i32, %c0_i32_0 : i32, i32
  }
  func.func @transform_4(%arg0: i32, %arg1: i32) -> (i32, i32, i32) {
    %c0_i32 = arith.constant 0 : i32
    %c0_i32_0 = arith.constant 0 : i32
    %c0_i32_1 = arith.constant 0 : i32
    %c0_i32_2 = arith.constant 0 : i32
    return %c0_i32, %c0_i32_0, %c0_i32_1 : i32, i32, i32
  }
  func.func @transform_5(%arg0: i32, %arg1: i32) -> (i32, i32, i32) {
    %c0_i32 = arith.constant 0 : i32
    %c0_i32_0 = arith.constant 0 : i32
    %c0_i32_1 = arith.constant 0 : i32
    %c0_i32_2 = arith.constant 0 : i32
    return %c0_i32, %c0_i32_0, %c0_i32_1 : i32, i32, i32
  }
  func.func @transform_6(%arg0: i32, %arg1: i32) -> (i32, i32, i32) {
    %c0_i32 = arith.constant 0 : i32
    %c0_i32_0 = arith.constant 0 : i32
    %c0_i32_1 = arith.constant 0 : i32
    %c0_i32_2 = arith.constant 0 : i32
    return %c0_i32, %c0_i32_0, %c0_i32_1 : i32, i32, i32
  }
  func.func @transform_7(%arg0: i32, %arg1: i32) -> (i32, i32) {
    %c0_i32 = arith.constant 0 : i32
    %c0_i32_0 = arith.constant 0 : i32
    %c0_i32_1 = arith.constant 0 : i32
    return %c0_i32, %c0_i32_0 : i32, i32
  }
  func.func @transform_8(%arg0: i32, %arg1: i32) -> (i32, i32) {
    %c0_i32 = arith.constant 0 : i32
    %c0_i32_0 = arith.constant 0 : i32
    %c0_i32_1 = arith.constant 0 : i32
    return %c0_i32, %c0_i32_0 : i32, i32
  }
  func.func @transform_9(%arg0: i32, %arg1: i32) -> (i32, i32) {
    %c0_i32 = arith.constant 0 : i32
    %c0_i32_0 = arith.constant 0 : i32
    %c0_i32_1 = arith.constant 0 : i32
    return %c0_i32, %c0_i32_0 : i32, i32
  }
  func.func @transform_10(%arg0: i32, %arg1: i32) -> (i32, i32) {
    %c0_i32 = arith.constant 0 : i32
    %c0_i32_0 = arith.constant 0 : i32
    %c0_i32_1 = arith.constant 0 : i32
    return %c0_i32, %c0_i32_0 : i32, i32
  }
  func.func @transform_11(%arg0: i32, %arg1: i32) -> (i32, i32) {
    %c0_i32 = arith.constant 0 : i32
    %c0_i32_0 = arith.constant 0 : i32
    %c0_i32_1 = arith.constant 0 : i32
    return %c0_i32, %c0_i32_0 : i32, i32
  }
  func.func @transform_12(%arg0: i32, %arg1: i32) -> (i32, i32) {
    %c0_i32 = arith.constant 0 : i32
    %c0_i32_0 = arith.constant 0 : i32
    %c0_i32_1 = arith.constant 0 : i32
    return %c0_i32, %c0_i32_0 : i32, i32
  }
  func.func @transform_13(%arg0: i32, %arg1: i32) -> (i32, i32, i32, i32) {
    %c0_i32 = arith.constant 0 : i32
    %c0_i32_0 = arith.constant 0 : i32
    %c0_i32_1 = arith.constant 0 : i32
    return %arg0, %arg1, %c0_i32, %c0_i32_0 : i32, i32, i32, i32
  }
}

</mosaic_0001>

<bundles_post_ra>
// kernel: tpu_custom_call.1
= control target key start
LH: loop header
LB: loop body
LE: loop exit
PB: predicated region body
PF: predicated region fallthrough
CT: control target
= control target key end

     0   :  { %s3808_s25 = smov 0   ;;  %s3810_s26 = smov 0   ;;  %s5327_s0 = inlined_call_operand.vmem [shape: f32[2,18,24,4], index: 0, kind: input, shape index: {}]   ;;  %s5328_s1 = inlined_call_operand.vmem [shape: bf16[4,128], index: 1, kind: input, shape index: {}]   ;;  %s5329_s2 = inlined_call_operand.vmem [shape: f32[1,128], index: 2, kind: input, shape index: {}]   ;;  %s5330_s3 = inlined_call_operand.vmem [shape: f32[1,128], index: 3, kind: input, shape index: {}]   ;;  %s5331_s4 = inlined_call_operand.vmem [shape: f32[3,3,128], index: 4, kind: input, shape index: {}]   ;;  %s5332_s5 = inlined_call_operand.vmem [shape: f32[1,1,128], index: 5, kind: input, shape index: {}]   ;;  %s5333_s6 = inlined_call_operand.vmem [shape: f32[1,1,128], index: 6, kind: input, shape index: {}]   ;;  %s5334_s7 = inlined_call_operand.vmem [shape: bf16[128,8], index: 7, kind: input, shape index: {}]   ;;  %s5335_s8 = inlined_call_operand.vmem [shape: f32[1,8], index: 8, kind: input, shape index: {}]   ;;  %s5336_s9 = inlined_call_operand.vmem [shape: f32[1,8], index: 9, kind: input, shape index: {}]   ;;  %s5337_s10 = inlined_call_operand.vmem [shape: bf16[4,8], index: 10, kind: input, shape index: {}]   ;;  %s5338_s11 = inlined_call_operand.vmem [shape: f32[1,8], index: 11, kind: input, shape index: {}]   ;;  %s5339_s12 = inlined_call_operand.vmem [shape: f32[1,8], index: 12, kind: input, shape index: {}]   ;;  %s5340_s13 = inlined_call_operand.vmem [shape: f32[2,16,16,8], index: 13, kind: output, shape index: {}]  }
   0x1   :  { %s3812_s27 = smov 0  }
   0x2 LB: > { %s35_s28 = sadd.s32 1, %s3730_s26  ;;  %p3307_p0 = scmp.ge.s32.totalorder %s3734_s27, 1  ;;  %s3734_s27 = sphi %s3812_s27, %s23_s27   ;;  %s3730_s26 = sphi %s3810_s26, %s5342_s26   ;;  %s3726_s25 = sphi %s3808_s25, %s5341_s25  }
   0x3   : > { %p37_p1 = scmp.ge.s32.totalorder %s35_s28, 2  ;;  %p401_p2 = scmp.lt.s32.totalorder %s3734_s27, 3 }
   0x5   : > { %s5344_s28 = smov (%p37_p1, %s35_s28), 0  ;;  %p402_p3 = pnand %p3307_p0, %p401_p2 }
   0x6   : > { %v551_v0 = vld [vmem:[%s5328_s1] sm:$0x3] (!%p402_p3)  ;;  %vm634_vm0 = vcmask (!%p402_p3), 1041408   ;;  %p450_p4 = scmp.lt.s32.totalorder (!%p402_p3), %s3726_s25, 1  ;;  %v3736_v1 = vmov (!%p402_p3), 0.0   ;;  %vm3737_vm1 = vmmov (!%p402_p3), 0  }
   0x7   : > { %405 = sbr.rel (%p402_p3) target bundleno = 760 (0x2f8), region = 72  ;;  %3474 = vmatprep.subr.bf16.mxu0 (!%p402_p3), %v3736_v1  ;;  %1415 = vst [vmem:[#allocation2] sm:$0xff] (!%p402_p3), %v3736_v1  ;;  %1416 = vst [vmem:[#allocation2 + $0x8] sm:$0xff] (!%p402_p3), %v3736_v1  ;;  %v636_v2 = vsel (!%p402_p3), %vm634_vm0, %v551_v0, 0  ;;  %3476 = vmatprep.mubr.msk.bf16.mxu0 (!%p402_p3), %vm3737_vm1, %v3736_v1  ;;  %vm552_vm2 = vcmask (!%p402_p3), 31744   ;;  %vm3177_vm5 = vcmask (!%p402_p3), 64512  }
   0x8   : > { %1417 = vst [vmem:[#allocation2 + $0x10] sm:$0xff] (!%p402_p3), %v3736_v1  ;;  %1466 = vst [vmem:[#allocation2 + $0x198] sm:$0xff] (!%p402_p3), %v3736_v1  ;;  %3475 = vmatpush3.bf16.msra.mxu0 (!%p402_p3), %v636_v2  ;;  %3666 = vmatprep.subr.bf16.mxu1 (!%p402_p3), %v3736_v1 }
   0x9   : > { %1467 = vst [vmem:[#allocation2 + $0x1a0] sm:$0xff] (!%p402_p3), %v3736_v1  ;;  %1468 = vst [vmem:[#allocation2 + $0x1a8] sm:$0xff] (!%p402_p3), %v3736_v1  ;;  %3667 = vmatpush3.bf16.msra.mxu1 (!%p402_p3), %v636_v2  ;;  %3564 = vmatprep.mubr.msk.bf16.mxu1 (!%p402_p3), %vm3737_vm1, %v3736_v1  ;;  %v3696_v2 = vld [vmem:[%s5334_s7] sm:$0xff] (!%p402_p3)  }
   0xa   : > { %3584 = vmatprep.subr.bf16.mxu1 (!%p402_p3), %v3696_v2 }
   0xe   : > { %s5346_s25 = smov (!%p450_p4, %s3726_s25), 1 }
   0xf   : > { %s3669_s14 = smul.u32 432, %s5346_s25  ;;  %s3404_s19 = sshll.u32 %s5346_s25, 8 }
  0x10   : > { %s5109_s25 = scalar_lea.vmem %s5340_s13, %s3404_s19 }
  0x11   : > { %s3848_s17 = scalar_lea.vmem %s5327_s0, %s3669_s14 }
  0x12   : > { %v470_v3 = vld [vmem:[%s3848_s17] sm:$0xff]  ;;  %v471_v4 = vld [vmem:[%s3848_s17 + $0x8] sm:$0xff]  ;;  %v472_v6 = vld [vmem:[%s3848_s17 + $0x10] sm:$0xff] }
  0x13   : > { %v524_v5 = vpack.c.bf16 %v471_v4, %v470_v3  ;;  %v473_v7 = vld [vmem:[%s3848_s17 + $0x18] sm:$0xff]  ;;  %v514_v9 = vld [vmem:[%s3848_s17 + $0x160] sm:$0xff]  ;;  %v515_v10 = vld [vmem:[%s3848_s17 + $0x168] sm:$0xff] }
  0x14   : > { %v525_v8 = vpack.c.bf16 %v473_v7, %v472_v6  ;;  %v474_v11 = vld [vmem:[%s3848_s17 + $0x20] sm:$0xff]  ;;  %v475_v12 = vld [vmem:[%s3848_s17 + $0x28] sm:$0xff]  ;;  %v546_v13 = vpack.c.bf16 %v515_v10, %v514_v9  ;;  %v516_v15 = vld [vmem:[%s3848_s17 + $0x170] sm:$0xff] }
  0x15   : > { %3477 = vmatmul.mubr.msk.bf16.vlgmr.msra.gmra.mrb[0].mxu0 %vm552_vm2, %v524_v5  ;;  %v526_v14 = vpack.c.bf16 %v475_v12, %v474_v11  ;;  %v517_v16 = vld [vmem:[%s3848_s17 + $0x178] sm:$0xff]  ;;  %v476_v18 = vld [vmem:[%s3848_s17 + $0x30] sm:$0xff]  ;;  %v518_v21 = vld [vmem:[%s3848_s17 + $0x180] sm:$0xff] }
  0x16   : > { %3480 = vmatprep.mubr.msk.bf16.mxu0 %vm3737_vm1, %v3736_v1  ;;  %3565 = vmatmul.mubr.msk.bf16.vlgmr.msra.gmra.mrb[0].mxu1 %vm552_vm2, %v546_v13  ;;  %v547_v17 = vpack.c.bf16 %v517_v16, %v516_v15  ;;  %v477_v19 = vld [vmem:[%s3848_s17 + $0x38] sm:$0xff]  ;;  %v519_v22 = vld [vmem:[%s3848_s17 + $0x188] sm:$0xff]  ;;  %v478_v24 = vld [vmem:[%s3848_s17 + $0x40] sm:$0xff] }
  0x17   : > { %3568 = vmatprep.mubr.msk.bf16.mxu1 %vm3737_vm1, %v3736_v1  ;;  %v527_v20 = vpack.c.bf16 %v477_v19, %v476_v18  ;;  %v548_v23 = vpack.c.bf16 %v519_v22, %v518_v21  ;;  %v479_v25 = vld [vmem:[%s3848_s17 + $0x48] sm:$0xff]  ;;  %v520_v27 = vld [vmem:[%s3848_s17 + $0x190] sm:$0xff]  ;;  %v521_v28 = vld [vmem:[%s3848_s17 + $0x198] sm:$0xff]  ;;  %3585 = vmatpush3.bf16.msra.mxu1 %v3696_v2 }
  0x18   : > { %v528_v26 = vpack.c.bf16 %v479_v25, %v478_v24  ;;  %v549_v29 = vpack.c.bf16 %v521_v28, %v520_v27  ;;  %v480_v30 = vld [vmem:[%s3848_s17 + $0x50] sm:$0xff]  ;;  %v481_v31 = vld [vmem:[%s3848_s17 + $0x58] sm:$0xff]  ;;  %v482_v33 = vld [vmem:[%s3848_s17 + $0x60] sm:$0xff] }
  0x19   : > { %v529_v32 = vpack.c.bf16 %v481_v31, %v480_v30  ;;  %v483_v34 = vld [vmem:[%s3848_s17 + $0x68] sm:$0xff]  ;;  %v484_v36 = vld [vmem:[%s3848_s17 + $0x70] sm:$0xff]  ;;  %v485_v37 = vld [vmem:[%s3848_s17 + $0x78] sm:$0xff]  ;;  %v1081_v31 = vlaneseq }
  0x1a   : > { %v530_v35 = vpack.c.bf16 %v483_v34, %v482_v33  ;;  %v531_v38 = vpack.c.bf16 %v485_v37, %v484_v36  ;;  %v486_v39 = vld [vmem:[%s3848_s17 + $0x80] sm:$0xff]  ;;  %v487_v40 = vld [vmem:[%s3848_s17 + $0x88] sm:$0xff]  ;;  %v488_v42 = vld [vmem:[%s3848_s17 + $0x90] sm:$0xff] }
  0x1b   : > { %v532_v41 = vpack.c.bf16 %v487_v40, %v486_v39  ;;  %v489_v43 = vld [vmem:[%s3848_s17 + $0x98] sm:$0xff]  ;;  %v490_v45 = vld [vmem:[%s3848_s17 + $0xa0] sm:$0xff]  ;;  %v491_v46 = vld [vmem:[%s3848_s17 + $0xa8] sm:$0xff]  ;;  %v4005_v34 = vshrl.u32 %v1081_v31, 7 }
  0x1c   : > { %v533_v44 = vpack.c.bf16 %v489_v43, %v488_v42  ;;  %v534_v47 = vpack.c.bf16 %v491_v46, %v490_v45  ;;  %v492_v48 = vld [vmem:[%s3848_s17 + $0xb0] sm:$0xff]  ;;  %v493_v49 = vld [vmem:[%s3848_s17 + $0xb8] sm:$0xff]  ;;  %v494_v51 = vld [vmem:[%s3848_s17 + $0xc0] sm:$0xff] }
  0x1d   : > { %3481 = vmatmul.mubr.msk.bf16.gmra.mrb[4].mxu0 %vm552_vm2, %v525_v8  ;;  %v535_v50 = vpack.c.bf16 %v493_v49, %v492_v48  ;;  %v495_v52 = vld [vmem:[%s3848_s17 + $0xc8] sm:$0xff]  ;;  %v496_v54 = vld [vmem:[%s3848_s17 + $0xd0] sm:$0xff]  ;;  %v497_v55 = vld [vmem:[%s3848_s17 + $0xd8] sm:$0xff]  ;;  %vm1139_vm3 = vcmp.ge.s32.totalorder %v4005_v34, 1 }
  0x1e   : > { %3484 = vmatprep.mubr.msk.bf16.mxu0 %vm3737_vm1, %v3736_v1  ;;  %3569 = vmatmul.mubr.msk.bf16.gmra.mrb[4].mxu1 %vm552_vm2, %v547_v17  ;;  %v536_v53 = vpack.c.bf16 %v495_v52, %v494_v51  ;;  %v537_v56 = vpack.c.bf16 %v497_v55, %v496_v54  ;;  %v498_v57 = vld [vmem:[%s3848_s17 + $0xe0] sm:$0xff]  ;;  %v499_v58 = vld [vmem:[%s3848_s17 + $0xe8] sm:$0xff]  ;;  %v500_v60 = vld [vmem:[%s3848_s17 + $0xf0] sm:$0xff] }
  0x1f   : > { %3572 = vmatprep.mubr.msk.bf16.mxu1 %vm3737_vm1, %v3736_v1  ;;  %v538_v59 = vpack.c.bf16 %v499_v58, %v498_v57  ;;  %v501_v61 = vld [vmem:[%s3848_s17 + $0xf8] sm:$0xff]  ;;  %v502_v63 = vld [vmem:[%s3848_s17 + $0x100] sm:$0xff]  ;;  %v503_v0 = vld [vmem:[%s3848_s17 + $0x108] sm:$0xff] }
  0x20   : > { %v539_v62 = vpack.c.bf16 %v501_v61, %v500_v60  ;;  %v540_v3 = vpack.c.bf16 %v503_v0, %v502_v63  ;;  %v3697_v4 = vld [vmem:[%s5334_s7 + $0x8] sm:$0xff]   ;;  %v504_v5 = vld [vmem:[%s3848_s17 + $0x110] sm:$0xff]  ;;  %v505_v6 = vld [vmem:[%s3848_s17 + $0x118] sm:$0xff]  ;;  %v4041_v60 = vadd.s32 16, %v4005_v34 }
  0x21   : > { %3586 = vmatprep.subr.bf16.mxu1 %v3697_v4  ;;  %v3698_v7 = vld [vmem:[%s5334_s7 + $0x10] sm:$0xff]   ;;  %v541_v8 = vpack.c.bf16 %v505_v6, %v504_v5  ;;  %v3699_v9 = vld [vmem:[%s5334_s7 + $0x18] sm:$0xff]   ;;  %v506_v10 = vld [vmem:[%s3848_s17 + $0x120] sm:$0xff] }
  0x22   : > { %3587 = vmatpush3.bf16.msra.mxu1 %v3697_v4  ;;  %v507_v11 = vld [vmem:[%s3848_s17 + $0x128] sm:$0xff]  ;;  %v3700_v12 = vld [vmem:[%s5334_s7 + $0x20] sm:$0xff]   ;;  %v508_v18 = vld [vmem:[%s3848_s17 + $0x130] sm:$0xff]  ;;  %vm1198_vm4 = vcmp.le.s32.totalorder %v4041_v60, 16 }
  0x23   : > { %3588 = vmatprep.subr.bf16.mxu1 %v3698_v7  ;;  %v542_v13 = vpack.c.bf16 %v507_v11, %v506_v10  ;;  %v522_v15 = vld [vmem:[%s3848_s17 + $0x1a0] sm:$0xff]  ;;  %v523_v16 = vld [vmem:[%s3848_s17 + $0x1a8] sm:$0xff]  ;;  %v509_v19 = vld [vmem:[%s3848_s17 + $0x138] sm:$0xff] }
  0x24   : > { %v550_v17 = vpack.c.bf16 %v523_v16, %v522_v15  ;;  %v543_v21 = vpack.c.bf16 %v509_v19, %v508_v18  ;;  %v3703_v22 = vld [vmem:[%s5334_s7 + $0x38] sm:$0xff]   ;;  %v511_v24 = vld [vmem:[%s3848_s17 + $0x148] sm:$0xff]  ;;  %v4010_v36 = vld [vmem:[%s5329_s2] ss:$0 sm:$0xff] }
  0x25   : > { %3485 = vmatmul.mubr.msk.bf16.gmra.mrb[8].mxu0 %vm552_vm2, %v526_v14  ;;  %v3701_v14 = vld [vmem:[%s5334_s7 + $0x28] sm:$0xff]   ;;  %v513_v27 = vld [vmem:[%s3848_s17 + $0x158] sm:$0xff]  ;;  %v4017_v40 = vld [vmem:[%s5330_s3] ss:$0 sm:$0xff] }
  0x26   : > { %3488 = vmatprep.mubr.msk.bf16.mxu0 %vm3737_vm1, %v3736_v1  ;;  %3573 = vmatmul.mubr.msk.bf16.gmra.mrb[8].mxu1 %vm552_vm2, %v548_v23  ;;  %v510_v23 = vld [vmem:[%s3848_s17 + $0x140] sm:$0xff] }
  0x27   : > { %3576 = vmatprep.mubr.msk.bf16.mxu1 %vm3737_vm1, %v3736_v1  ;;  %3589 = vmatpush3.bf16.msra.mxu1 %v3698_v7  ;;  %v544_v25 = vpack.c.bf16 %v511_v24, %v510_v23  ;;  %v1572_v48 = vld [vmem:[#allocation2 + $0x1] sm:$0xff] }
  0x28   : > { %3590 = vmatprep.subr.bf16.mxu1 %v3699_v9  ;;  %v1470_v54 = vld [vmem:[%s5331_s4 + $0x4] sm:$0x7] }
  0x2b   : > { %3591 = vmatpush3.bf16.msra.mxu1 %v3699_v9 }
  0x2c   : > { %3592 = vmatprep.subr.bf16.mxu1 %v3700_v12 }
  0x2d   : > { %3489 = vmatmul.mubr.msk.bf16.gmra.mrb[12].mxu0 %vm552_vm2, %v527_v20  ;;  %v3702_v20 = vld [vmem:[%s5334_s7 + $0x30] sm:$0xff]  }
  0x2e   : > { %3492 = vmatprep.mubr.msk.bf16.mxu0 %vm3737_vm1, %v3736_v1  ;;  %3577 = vmatmul.mubr.msk.bf16.gmra.mrb[12].mxu1 %vm552_vm2, %v549_v29 }
  0x2f   : > { %3580 = vmatprep.mubr.msk.bf16.mxu1 %vm3737_vm1, %v3736_v1  ;;  %3593 = vmatpush3.bf16.msra.mxu1 %v3700_v12  ;;  %v1471_v12 = vld [vmem:[%s5331_s4 + $0x8] sm:$0x7] }
  0x30   : > { %3594 = vmatprep.subr.bf16.mxu1 %v3701_v14 }
  0x33   : > { %3595 = vmatpush3.bf16.msra.mxu1 %v3701_v14 }
  0x34   : > { %3596 = vmatprep.subr.bf16.mxu1 %v3702_v20 }
  0x35   : > { %3493 = vmatmul.mubr.msk.bf16.gmra.mrb[16].mxu0 %vm552_vm2, %v528_v26  ;;  %v512_v26 = vld [vmem:[%s3848_s17 + $0x150] sm:$0xff] }
  0x36   : > { %3496 = vmatprep.mubr.msk.bf16.mxu0 %vm3737_vm1, %v3736_v1  ;;  %3581 = vmatmul.mubr.msk.bf16.gmra.mrb[16].mxu1 %vm552_vm2, %v550_v17  ;;  %v545_v28 = vpack.c.bf16 %v513_v27, %v512_v26 }
  0x37   : > { %3597 = vmatpush3.bf16.msra.mxu1 %v3702_v20 }
  0x38   : > { %3598 = vmatprep.subr.bf16.mxu1 %v3703_v22 }
  0x3b   : > { %3599 = vmatpush3.bf16.msra.mxu1 %v3703_v22 }
  0x3d   : > { %3497 = vmatmul.mubr.msk.bf16.gmra.mrb[20].mxu0 %vm552_vm2, %v529_v32 }
  0x3e   : > { %3500 = vmatprep.mubr.msk.bf16.mxu0 %vm3737_vm1, %v3736_v1 }
  0x45   : > { %3501 = vmatmul.mubr.msk.bf16.gmra.mrb[24].mxu0 %vm552_vm2, %v530_v35 }
  0x46   : > { %3504 = vmatprep.mubr.msk.bf16.mxu0 %vm3737_vm1, %v3736_v1 }
  0x4d   : > { %3505 = vmatmul.mubr.msk.bf16.gmra.mrb[28].mxu0 %vm552_vm2, %v531_v38  ;;  %v1606_v38 = vsub.s32 1, %v4005_v34 }
  0x4e   : > { %3508 = vmatprep.mubr.msk.bf16.mxu0 %vm3737_vm1, %v3736_v1 }
  0x55   : > { %3509 = vmatmul.mubr.msk.bf16.gmra.mrb[32].mxu0 %vm552_vm2, %v532_v41  ;;  %v1469_v41 = vld [vmem:[%s5331_s4] sm:$0x7] }
  0x56   : > { %3512 = vmatprep.mubr.msk.bf16.mxu0 %vm3737_vm1, %v3736_v1 }
  0x5d   : > { %3513 = vmatmul.mubr.msk.bf16.gmra.mrb[36].mxu0 %vm552_vm2, %v533_v44  ;;  %v1706_v44 = vsub.s32 2, %v4005_v34 }
  0x5e   : > { %3516 = vmatprep.mubr.msk.bf16.mxu0 %vm3737_vm1, %v3736_v1 }
  0x5f   : > { %v4030_v51 = vrot.slane %v1469_v41, %v1706_v44 }
  0x65   : > { %3517 = vmatmul.mubr.msk.bf16.gmra.mrb[40].mxu0 %vm552_vm2, %v534_v47  ;;  %v4027_v47 = vrot.slane %v1469_v41, %v1606_v38 }
  0x66   : > { %3520 = vmatprep.mubr.msk.bf16.mxu0 %vm3737_vm1, %v3736_v1 }
  0x67   : > { %v1608_v58 = vmul.f32 %v4027_v47, %v1572_v48 }
  0x6d   : > { %3521 = vmatmul.mubr.msk.bf16.gmra.mrb[44].mxu0 %vm552_vm2, %v535_v50  ;;  %v1573_v50 = vld [vmem:[#allocation2 + $0x9] sm:$0xff] }
  0x6e   : > { %3524 = vmatprep.mubr.msk.bf16.mxu0 %vm3737_vm1, %v3736_v1  ;;  %v1609_v61 = vmul.f32 %v4027_v47, %v1573_v50 }
  0x75   : > { %3525 = vmatmul.mubr.msk.bf16.gmra.mrb[48].mxu0 %vm552_vm2, %v536_v53 }
  0x76   : > { %3528 = vmatprep.mubr.msk.bf16.mxu0 %vm3737_vm1, %v3736_v1 }
  0x7d   : > { %3529 = vmatmul.mubr.msk.bf16.gmra.mrb[52].mxu0 %vm552_vm2, %v537_v56 }
  0x7e   : > { %3532 = vmatprep.mubr.msk.bf16.mxu0 %vm3737_vm1, %v3736_v1 }
  0x85   : > { %3533 = vmatmul.mubr.msk.bf16.gmra.mrb[56].mxu0 %vm552_vm2, %v538_v59 }
  0x86   : > { %3536 = vmatprep.mubr.msk.bf16.mxu0 %vm3737_vm1, %v3736_v1 }
  0x8d   : > { %3537 = vmatmul.mubr.msk.bf16.gmra.mrb[60].mxu0 %vm552_vm2, %v539_v62  ;;  %v1672_v62 = vld [vmem:[#allocation2 + $0x2] sm:$0xff] }
  0x8e   : > { %3540 = vmatprep.mubr.msk.bf16.mxu0 %vm3737_vm1, %v3736_v1 }
  0x95   : > { %3541 = vmatmul.mubr.msk.bf16.gmra.mrb[64].mxu0 %vm552_vm2, %v540_v3  ;;  %v1673_v3 = vld [vmem:[#allocation2 + $0xa] sm:$0xff] }
  0x96   : > { %3544 = vmatprep.mubr.msk.bf16.mxu0 %vm3737_vm1, %v3736_v1  ;;  %v1709_v10 = vmul.f32 %v4030_v51, %v1673_v3 }
  0x9d   : > { %3545 = vmatmul.mubr.msk.bf16.gmra.mrb[68].mxu0 %vm552_vm2, %v541_v8  ;;  %v1708_v8 = vmul.f32 %v4030_v51, %v1672_v62 }
  0x9e   : > { %3548 = vmatprep.mubr.msk.bf16.mxu0 %vm3737_vm1, %v3736_v1 }
  0xa5   : > { %3549 = vmatmul.mubr.msk.bf16.gmra.mrb[72].mxu0 %vm552_vm2, %v542_v13  ;;  %v4055_v13 = vrot.slane %v1470_v54, %v1606_v38 }
  0xa6   : > { %3552 = vmatprep.mubr.msk.bf16.mxu0 %vm3737_vm1, %v3736_v1 }
  0xad   : > { %3553 = vmatmul.mubr.msk.bf16.gmra.mrb[76].mxu0 %vm552_vm2, %v543_v21  ;;  %v4061_v21 = vrot.slane %v1470_v54, %v1706_v44 }
  0xae   : > { %3556 = vmatprep.mubr.msk.bf16.mxu0 %vm3737_vm1, %v3736_v1 }
  0xb5   : > { %3557 = vmatmul.mubr.msk.bf16.gmra.mrb[80].mxu0 %vm552_vm2, %v544_v25 }
  0xb6   : > { %3560 = vmatprep.mubr.msk.bf16.mxu0 %vm3737_vm1, %v3736_v1  ;;  %v1506_v1 = vsub.s32 0, %v4005_v34 }
  0xb8   : > { %v4025_v46 = vrot.slane %v1469_v41, %v1506_v1  ;;  %v4046_v4 = vrot.slane %v1470_v54, %v1506_v1  ;;  %v4065_v27 = vrot.slane %v1471_v12, %v1506_v1 }
  0xba   : > { %v1508_v57 = vmul.f32 0.0, %v4025_v46 }
  0xbc   : > { %v1640_v7 = vadd.f32 %v1608_v58, %v1508_v57  ;;  %v1641_v9 = vadd.f32 %v1609_v61, %v1508_v57 }
  0xbd   : > { %3561 = vmatmul.mubr.msk.bf16.gmra.mrb[84].mxu0 %vm552_vm2, %v545_v28  ;;  %v4067_v28 = vrot.slane %v1471_v12, %v1606_v38 }
  0xbe   : > { %v1740_v18 = vadd.f32 %v1708_v8, %v1640_v7  ;;  %v1741_v23 = vadd.f32 %v1709_v10, %v1641_v9 }
  0xe8   : > { %v672_v29 = vpop.f32.mrb[0].mxu0 }
  0xe9   : > { %v3478_v30 = vpop.f32.mrb[1].mxu0  ;;  %v848_v20 = vpop.f32.mrb[0].mxu1 }
  0xea   : > { %v675_v32 = vpop.f32.mrb[2].mxu0  ;;  %v938_v25 = vmul.f32 %v4010_v36, %v848_v20  ;;  %v3566_v26 = vpop.f32.mrb[1].mxu1 }
  0xeb   : > { %v3479_v33 = vpop.f32.mrb[3].mxu0  ;;  %v851_v32 = vpop.f32.mrb[2].mxu1 }
  0xec   : > { %v4071_v33 = vrot.slane %v1471_v12, %v1706_v44  ;;  %v3567_v41 = vpop.f32.mrb[3].mxu1 }
  0xf0   : > { %v680_v35 = vpop.f32.mrb[4].mxu0 }
  0xf1   : > { %v3482_v37 = vpop.f32.mrb[5].mxu0 }
  0xf2   : > { %v683_v39 = vpop.f32.mrb[6].mxu0  ;;  %v4075_v37 = vadd.f32 %v4017_v40, %v938_v25 }
  0xf3   : > { %v897_v42 = vmul.f32 %v4010_v36, %v683_v39  ;;  %v3483_v43 = vpop.f32.mrb[7].mxu0  ;;  %v939_v39 = vmul.f32 %v4010_v36, %v851_v32 }
  0xf4   : > { %v1053_v44 = vmax.f32 %v4075_v37, 0.0 }
  0xf5   : > { %v958_v45 = vadd.f32 %v4017_v40, %v897_v42 }
  0xf7   : > { %v1012_v49 = vmax.f32 %v958_v45, 0.0  ;;  %v856_v45 = vpop.f32.mrb[4].mxu1 }
  0xf8   : > { %v688_v52 = vpop.f32.mrb[8].mxu0  ;;  %v3570_v54 = vpop.f32.mrb[5].mxu1 }
  0xf9   : > { %v1364_v53 = vsel %vm1139_vm3, %v1012_v49, 0.0  ;;  %v898_v55 = vmul.f32 %v4010_v36, %v688_v52  ;;  %v3486_v56 = vpop.f32.mrb[9].mxu0  ;;  %v4082_v52 = vadd.f32 %v4017_v40, %v939_v39 }
  0xfa   : > { %1418 = vst [vmem:[#allocation2 + $0x18] sm:$0xff] %v1364_v53  ;;  %v691_v59 = vpop.f32.mrb[10].mxu0  ;;  %v1809_v19 = vmul.f32 %v4046_v4, %v1364_v53  ;;  %v1510_v35 = vmul.f32 %v4025_v46, %v1364_v53  ;;  %v940_v53 = vmul.f32 %v4010_v36, %v856_v45 }
  0xfb   : > { %v959_v63 = vadd.f32 %v4017_v40, %v898_v55  ;;  %v899_v0 = vmul.f32 %v4010_v36, %v691_v59  ;;  %v3487_v2 = vpop.f32.mrb[11].mxu0 }
  0xfc   : > { %v1841_v42 = vadd.f32 %v1809_v19, %v1740_v18  ;;  %v859_v2 = vpop.f32.mrb[6].mxu1  ;;  %v2854_v19 = vld [vmem:[%s5337_s10] sm:$0x3] }
  0xfd   : > { %v1013_v5 = vmax.f32 %v959_v63, 0.0  ;;  %v960_v6 = vadd.f32 %v4017_v40, %v899_v0  ;;  %3668 = vmatprep.subr.msk.bf16.mxu1 %vm634_vm0, %v2854_v19  ;;  %v4140_v19 = vld [vmem:[%s5332_s5] ss:$0 sm:$0xff] }
  0xff   : > { %1419 = vst [vmem:[#allocation2 + $0x20] sm:$0xff] %v1013_v5  ;;  %v1014_v11 = vmax.f32 %v960_v6, 0.0  ;;  %v1810_v24 = vmul.f32 %v4046_v4, %v1013_v5  ;;  %v1511_v43 = vmul.f32 %v4025_v46, %v1013_v5 }
 0x100   : > { %v696_v14 = vpop.f32.mrb[12].mxu0 }
 0x101   : > { %v1366_v15 = vsel %vm1198_vm4, %v1014_v11, 0.0  ;;  %v900_v16 = vmul.f32 %v4010_v36, %v696_v14  ;;  %v3490_v17 = vpop.f32.mrb[13].mxu0  ;;  %v1842_v48 = vadd.f32 %v1810_v24, %v1741_v23  ;;  %v3571_v11 = vpop.f32.mrb[7].mxu1 }
 0x102   : > { %1420 = vst [vmem:[#allocation2 + $0x28] sm:$0xff] %v1366_v15  ;;  %v699_v22 = vpop.f32.mrb[14].mxu0  ;;  %v864_v18 = vpop.f32.mrb[8].mxu1 }
 0x103   : > { %v961_v29 = vadd.f32 %v4017_v40, %v900_v16  ;;  %v901_v30 = vmul.f32 %v4010_v36, %v699_v22  ;;  %v3491_v31 = vpop.f32.mrb[15].mxu0  ;;  %v3574_v26 = vpop.f32.mrb[9].mxu1 }
 0x105   : > { %v1015_v1 = vmax.f32 %v961_v29, 0.0  ;;  %v962_v38 = vadd.f32 %v4017_v40, %v901_v30 }
 0x106   : > { %v1873_v49 = vld [vmem:[#allocation2 + $0x19] sm:$0xff] }
 0x107   : > { %v1973_v50 = vld [vmem:[#allocation2 + $0x1a] sm:$0xff]  ;;  %v1367_v55 = vsel %vm1139_vm3, %v1015_v1, 0.0  ;;  %v1016_v56 = vmax.f32 %v962_v38, 0.0  ;;  %v1909_v57 = vmul.f32 %v4055_v13, %v1873_v49  ;;  %v1610_v62 = vmul.f32 %v1873_v49, %v4027_v47 }
 0x108   : > { %v2009_v58 = vmul.f32 %v4061_v21, %v1973_v50  ;;  %1421 = vst [vmem:[#allocation2 + $0x30] sm:$0xff] %v1367_v55  ;;  %v704_v59 = vpop.f32.mrb[16].mxu0  ;;  %v2110_v61 = vmul.f32 %v4065_v27, %v1367_v55  ;;  %v1710_v63 = vmul.f32 %v1973_v50, %v4030_v51  ;;  %v1811_v0 = vmul.f32 %v4046_v4, %v1367_v55 }
 0x109   : > { %1422 = vst [vmem:[#allocation2 + $0x38] sm:$0xff] %v1016_v56  ;;  %v902_v3 = vmul.f32 %v4010_v36, %v704_v59  ;;  %v3494_v5 = vpop.f32.mrb[17].mxu0  ;;  %v1874_v6 = vld [vmem:[#allocation2 + $0x21] sm:$0xff]  ;;  %v1941_v7 = vadd.f32 %v1909_v57, %v1841_v42  ;;  %v2111_v9 = vmul.f32 %v4065_v27, %v1016_v56  ;;  %v1812_v10 = vmul.f32 %v4046_v4, %v1016_v56 }
 0x10a   : > { %v1974_v8 = vld [vmem:[#allocation2 + $0x22] sm:$0xff]  ;;  %v707_v12 = vpop.f32.mrb[18].mxu0  ;;  %v1910_v14 = vmul.f32 %v4055_v13, %v1874_v6  ;;  %v1611_v16 = vmul.f32 %v1874_v6, %v4027_v47  ;;  %v1642_v17 = vadd.f32 %v1610_v62, %v1510_v35  ;;  %v1512_v32 = vmul.f32 %v4025_v46, %v1367_v55  ;;  %v4107_v35 = vpop.f32.mrb[10].mxu1 }
 0x10b   : > { %v2010_v15 = vmul.f32 %v4061_v21, %v1974_v8  ;;  %v963_v20 = vadd.f32 %v4017_v40, %v902_v3  ;;  %v903_v22 = vmul.f32 %v4010_v36, %v707_v12  ;;  %v3495_v23 = vpop.f32.mrb[19].mxu0  ;;  %v2041_v24 = vadd.f32 %v2009_v58, %v1941_v7  ;;  %v3575_v38 = vpop.f32.mrb[11].mxu1 }
 0x10c   : > { %v1711_v25 = vmul.f32 %v1974_v8, %v4030_v51  ;;  %v1942_v29 = vadd.f32 %v1910_v14, %v1842_v48  ;;  %v1643_v30 = vadd.f32 %v1611_v16, %v1511_v43  ;;  %v1742_v31 = vadd.f32 %v1710_v63, %v1642_v17  ;;  %v4115_v43 = vpop.f32.mrb[12].mxu1 }
 0x10d   : > { %v1017_v37 = vmax.f32 %v963_v20, 0.0  ;;  %v964_v39 = vadd.f32 %v4017_v40, %v903_v22  ;;  %v2142_v41 = vadd.f32 %v2110_v61, %v2041_v24  ;;  %v4111_v1 = vmul.f32 %v4025_v46, %v1016_v56  ;;  %v3578_v56 = vpop.f32.mrb[13].mxu1 }
 0x10e   : > { %v2042_v42 = vadd.f32 %v2010_v15, %v1942_v29  ;;  %v1743_v45 = vadd.f32 %v1711_v25, %v1643_v30  ;;  %v1843_v49 = vadd.f32 %v1811_v0, %v1742_v31  ;;  %v1405_v48 = vsel %vm1198_vm4, %v1053_v44, 0.0  ;;  %v875_v3 = vpop.f32.mrb[14].mxu1  ;;  %v4152_v31 = vld [vmem:[%s5333_s6] ss:$0 sm:$0xff] }
 0x10f   : > { %v1369_v50 = vsel %vm1198_vm4, %v1017_v37, 0.0  ;;  %v1018_v54 = vmax.f32 %v964_v39, 0.0  ;;  %1459 = vst [vmem:[#allocation2 + $0x160] sm:$0xff] %v1405_v48  ;;  %v1054_v55 = vmax.f32 %v4082_v52, 0.0  ;;  %v1001_v57 = vadd.f32 %v4017_v40, %v940_v53  ;;  %v3579_v8 = vpop.f32.mrb[15].mxu1 }
 0x110   : > { %1423 = vst [vmem:[#allocation2 + $0x40] sm:$0xff] %v1369_v50  ;;  %v712_v58 = vpop.f32.mrb[20].mxu0  ;;  %v2143_v59 = vadd.f32 %v2111_v9, %v2042_v42  ;;  %v2174_v61 = vld [vmem:[#allocation2 + $0x31] sm:$0xff]  ;;  %v1844_v63 = vadd.f32 %v1812_v10, %v1743_v45  ;;  %v941_v44 = vmul.f32 %v4010_v36, %v859_v2  ;;  %v4123_v0 = vmul.f32 %v4010_v36, %v864_v18 }
 0x111   : > { %v2274_v62 = vld [vmem:[#allocation2 + $0x32] sm:$0xff]  ;;  %v1370_v5 = vsel %vm1139_vm3, %v1018_v54, 0.0  ;;  %v904_v52 = vmul.f32 %v4010_v36, %v712_v58  ;;  %v3498_v6 = vpop.f32.mrb[21].mxu0  ;;  %v2210_v53 = vmul.f32 %v4067_v28, %v2174_v61  ;;  %v1911_v10 = vmul.f32 %v2174_v61, %v4055_v13 }
 0x112   : > { %v2310_v7 = vmul.f32 %v4071_v33, %v2274_v62  ;;  %1424 = vst [vmem:[#allocation2 + $0x48] sm:$0xff] %v1370_v5  ;;  %v715_v9 = vpop.f32.mrb[22].mxu0  ;;  %v2011_v2 = vmul.f32 %v2274_v62, %v4061_v21  ;;  %v2112_v11 = vmul.f32 %v4065_v27, %v1370_v5  ;;  %v1612_v12 = vmul.f32 %v2174_v61, %v4027_v47 }
 0x113   : > { %v965_v14 = vadd.f32 %v4017_v40, %v904_v52  ;;  %v905_v15 = vmul.f32 %v4010_v36, %v715_v9  ;;  %v3499_v16 = vpop.f32.mrb[23].mxu0  ;;  %v2242_v17 = vadd.f32 %v2210_v53, %v2142_v41  ;;  %v1712_v18 = vmul.f32 %v2274_v62, %v4030_v51 }
 0x114   : > { %v1943_v20 = vadd.f32 %v1911_v10, %v1843_v49  ;;  %v1644_v22 = vadd.f32 %v1612_v12, %v1512_v32  ;;  %v1813_v23 = vmul.f32 %v4046_v4, %v1370_v5  ;;  %v4144_v24 = vmul.f32 %v4025_v46, %v1370_v5 }
 0x115   : > { %v1019_v25 = vmax.f32 %v965_v14, 0.0  ;;  %v966_v26 = vadd.f32 %v4017_v40, %v905_v15  ;;  %v2342_v29 = vadd.f32 %v2310_v7, %v2242_v17  ;;  %v1406_v30 = vsel %vm1139_vm3, %v1054_v55, 0.0 }
 0x116   : > { %v2043_v37 = vadd.f32 %v2011_v2, %v1943_v20  ;;  %v1744_v39 = vadd.f32 %v1712_v18, %v1644_v22  ;;  %1460 = vst [vmem:[#allocation2 + $0x168] sm:$0xff] %v1406_v30  ;;  %v1055_v32 = vmax.f32 %v1001_v57, 0.0  ;;  %v4155_v41 = vadd.f32 %v4017_v40, %v941_v44 }
 0x117   : > { %1425 = vst [vmem:[#allocation2 + $0x50] sm:$0xff] %v1019_v25  ;;  %v1020_v38 = vmax.f32 %v966_v26, 0.0  ;;  %v2175_v42 = vld [vmem:[#allocation2 + $0x39] sm:$0xff]  ;;  %v2381_v49 = vmul.f32 %v4140_v19, %v2342_v29  ;;  %v2113_v48 = vmul.f32 %v4065_v27, %v1019_v25  ;;  %v1814_v50 = vmul.f32 %v4046_v4, %v1019_v25 }
 0x118   : > { %v2275_v45 = vld [vmem:[#allocation2 + $0x3a] sm:$0xff]  ;;  %v720_v54 = vpop.f32.mrb[24].mxu0  ;;  %v2211_v55 = vmul.f32 %v4067_v28, %v2175_v42  ;;  %v1912_v57 = vmul.f32 %v2175_v42, %v4055_v13  ;;  %1461 = vst [vmem:[#allocation2 + $0x170] sm:$0xff] %v1055_v32  ;;  %v2144_v5 = vadd.f32 %v2112_v11, %v2043_v37  ;;  %v1613_v7 = vmul.f32 %v2175_v42, %v4027_v47 }
 0x119   : > { %v2311_v56 = vmul.f32 %v4071_v33, %v2275_v45  ;;  %v2012_v58 = vmul.f32 %v2275_v45, %v4061_v21  ;;  %v1372_v61 = vsel %vm1198_vm4, %v1020_v38, 0.0  ;;  %v906_v62 = vmul.f32 %v4010_v36, %v720_v54  ;;  %v3502_v44 = vpop.f32.mrb[25].mxu0 }
 0x11a   : > { %v2420_v3 = vadd.f32 %v4152_v31, %v2381_v49  ;;  %1426 = vst [vmem:[#allocation2 + $0x58] sm:$0xff] %v1372_v61  ;;  %v723_v52 = vpop.f32.mrb[26].mxu0  ;;  %v2243_v6 = vadd.f32 %v2211_v55, %v2143_v59  ;;  %v1944_v53 = vadd.f32 %v1912_v57, %v1844_v63  ;;  %v1713_v8 = vmul.f32 %v2275_v45, %v4030_v51 }
 0x11b   : > { %v967_v9 = vadd.f32 %v4017_v40, %v906_v62  ;;  %v907_v10 = vmul.f32 %v4010_v36, %v723_v52  ;;  %v3503_v2 = vpop.f32.mrb[27].mxu0  ;;  %v1845_v14 = vadd.f32 %v1813_v23, %v1744_v39  ;;  %v1645_v17 = vadd.f32 %v1613_v7, %v4111_v1 }
 0x11c   : > { %v2452_v12 = vmax.f32 %v2420_v3, 0.0  ;;  %v2343_v15 = vadd.f32 %v2311_v56, %v2243_v6  ;;  %v2044_v16 = vadd.f32 %v2012_v58, %v1944_v53  ;;  %v4174_v11 = vmul.f32 %v4025_v46, %v1019_v25 }
 0x11d   : > { %v1021_v59 = vmax.f32 %v967_v9, 0.0  ;;  %v968_v63 = vadd.f32 %v4017_v40, %v907_v10  ;;  %v1056_v18 = vmax.f32 %v4155_v41, 0.0  ;;  %v4180_v20 = vadd.f32 %v4017_v40, %v4123_v0 }
 0x11e   : > { %v2382_v22 = vmul.f32 %v4140_v19, %v2343_v15  ;;  %v2145_v26 = vadd.f32 %v2113_v48, %v2044_v16  ;;  %v2176_v23 = vld [vmem:[#allocation2 + $0x49] sm:$0xff]  ;;  %v1745_v30 = vadd.f32 %v1713_v8, %v1645_v17  ;;  %v4187_v1 = vmul.f32 %v4010_v36, %v4107_v35 }
 0x11f   : > { %v4183_v29 = vld [vmem:[#allocation2 + $0x4a] sm:$0xff]  ;;  %v4191_v25 = vsel %vm1139_vm3, %v1021_v59, 0.0  ;;  %v4193_v37 = vmax.f32 %v968_v63, 0.0  ;;  %v2212_v0 = vmul.f32 %v4067_v28, %v2176_v23  ;;  %v1913_v35 = vmul.f32 %v2176_v23, %v4055_v13 }
 0x120   : > { %v2312_v39 = vmul.f32 %v4071_v33, %v4183_v29  ;;  %1427 = vst [vmem:[#allocation2 + $0x60] sm:$0xff] %v4191_v25  ;;  %v728_v32 = vpop.f32.mrb[28].mxu0  ;;  %v2421_v38 = vadd.f32 %v4152_v31, %v2382_v22  ;;  %v1846_v42 = vadd.f32 %v1814_v50, %v1745_v30  ;;  %v2013_v45 = vmul.f32 %v4183_v29, %v4061_v21 }
 0x121   : > { %1428 = vst [vmem:[#allocation2 + $0x68] sm:$0xff] %v4193_v37  ;;  %v908_v49 = vmul.f32 %v4010_v36, %v728_v32  ;;  %v3506_v48 = vpop.f32.mrb[29].mxu0  ;;  %v2177_v54 = vld [vmem:[#allocation2 + $0x51] sm:$0xff]  ;;  %v2244_v55 = vadd.f32 %v2212_v0, %v2144_v5  ;;  %v2114_v57 = vmul.f32 %v4065_v27, %v4191_v25  ;;  %v2115_v58 = vmul.f32 %v4065_v27, %v4193_v37 }
 0x122   : > { %v2277_v56 = vld [vmem:[#allocation2 + $0x52] sm:$0xff]  ;;  %v731_v50 = vpop.f32.mrb[30].mxu0  ;;  %v2453_v61 = vmax.f32 %v2421_v38, 0.0  ;;  %v2213_v62 = vmul.f32 %v4067_v28, %v2177_v54  ;;  %v1914_v3 = vmul.f32 %v2177_v54, %v4055_v13  ;;  %v1945_v7 = vadd.f32 %v1913_v35, %v1845_v14 }
 0x123   : > { %v2313_v44 = vmul.f32 %v4071_v33, %v2277_v56  ;;  %v969_v52 = vadd.f32 %v4017_v40, %v908_v49  ;;  %v909_v6 = vmul.f32 %v4010_v36, %v731_v50  ;;  %v3507_v5 = vpop.f32.mrb[31].mxu0  ;;  %v2344_v53 = vadd.f32 %v2312_v39, %v2244_v55 }
 0x124   : > { %v2484_v8 = vpack.c.bf16 %v2453_v61, %v2452_v12  ;;  %v2245_v9 = vadd.f32 %v2213_v62, %v2145_v26  ;;  %v1946_v10 = vadd.f32 %v1914_v3, %v1846_v42  ;;  %v2014_v2 = vmul.f32 %v2277_v56, %v4061_v21 }
 0x125   : > { %v1023_v15 = vmax.f32 %v969_v52, 0.0  ;;  %v970_v16 = vadd.f32 %v4017_v40, %v909_v6  ;;  %v2383_v17 = vmul.f32 %v4140_v19, %v2344_v53  ;;  %v2045_v59 = vadd.f32 %v2013_v45, %v1945_v7 }
 0x126   : > { %3600 = vmatprep.mubr.bf16.mxu1 %v2484_v8  ;;  %v2345_v63 = vadd.f32 %v2313_v44, %v2245_v9  ;;  %v2046_v22 = vadd.f32 %v2014_v2, %v1946_v10  ;;  %v1614_v30 = vmul.f32 %v2176_v23, %v4027_v47  ;;  %v1615_v0 = vmul.f32 %v2177_v54, %v4027_v47 }
 0x127   : > { %v1375_v12 = vsel %vm1198_vm4, %v1023_v15, 0.0  ;;  %v1024_v14 = vmax.f32 %v970_v16, 0.0  ;;  %v2422_v26 = vadd.f32 %v4152_v31, %v2383_v17  ;;  %v2146_v39 = vadd.f32 %v2114_v57, %v2045_v59 }
 0x128   : > { %1429 = vst [vmem:[#allocation2 + $0x70] sm:$0xff] %v1375_v12  ;;  %v736_v32 = vpop.f32.mrb[32].mxu0  ;;  %v2384_v38 = vmul.f32 %v4140_v19, %v2345_v63  ;;  %v2147_v42 = vadd.f32 %v2115_v58, %v2046_v22  ;;  %v4223_v35 = vld [vmem:[#allocation2 + $0x61] sm:$0xff]  ;;  %v1646_v23 = vadd.f32 %v1614_v30, %v4144_v24  ;;  %v1647_v49 = vadd.f32 %v1615_v0, %v4174_v11 }
 0x129   : > { %v4225_v45 = vld [vmem:[#allocation2 + $0x62] sm:$0xff]  ;;  %v4231_v48 = vsel %vm1139_vm3, %v1024_v14, 0.0  ;;  %v910_v54 = vmul.f32 %v4010_v36, %v736_v32  ;;  %v3510_v55 = vpop.f32.mrb[33].mxu0  ;;  %v2454_v57 = vmax.f32 %v2422_v26, 0.0  ;;  %v2214_v50 = vmul.f32 %v4067_v28, %v4223_v35 }
 0x12a   : > { %1430 = vst [vmem:[#allocation2 + $0x78] sm:$0xff] %v4231_v48  ;;  %v739_v58 = vpop.f32.mrb[34].mxu0  ;;  %v2423_v61 = vadd.f32 %v4152_v31, %v2384_v38  ;;  %v2314_v24 = vmul.f32 %v4071_v33, %v4225_v45  ;;  %v1714_v11 = vmul.f32 %v4183_v29, %v4030_v51  ;;  %v1715_v62 = vmul.f32 %v2277_v56, %v4030_v51 }
 0x12b   : > { %v971_v44 = vadd.f32 %v4017_v40, %v910_v54  ;;  %v911_v3 = vmul.f32 %v4010_v36, %v739_v58  ;;  %v3511_v52 = vpop.f32.mrb[35].mxu0  ;;  %v2246_v6 = vadd.f32 %v2214_v50, %v2146_v39  ;;  %v1815_v5 = vmul.f32 %v4046_v4, %v4191_v25 }
 0x12c   : > { %v2455_v53 = vmax.f32 %v2423_v61, 0.0  ;;  %v1746_v7 = vadd.f32 %v1714_v11, %v1646_v23  ;;  %v1747_v8 = vadd.f32 %v1715_v62, %v1647_v49  ;;  %v1816_v9 = vmul.f32 %v4046_v4, %v4193_v37 }
 0x12d   : > { %v4249_v10 = vmax.f32 %v971_v44, 0.0  ;;  %v972_v29 = vadd.f32 %v4017_v40, %v911_v3  ;;  %v2346_v56 = vadd.f32 %v2314_v24, %v2246_v6  ;;  %v1915_v2 = vmul.f32 %v4223_v35, %v4055_v13 }
 0x12e   : > { %v2485_v15 = vpack.c.bf16 %v2455_v53, %v2454_v57  ;;  %v1847_v16 = vadd.f32 %v1815_v5, %v1746_v7  ;;  %v1848_v17 = vadd.f32 %v1816_v9, %v1747_v8  ;;  %v2015_v59 = vmul.f32 %v4225_v45, %v4061_v21 }
 0x12f   : > { %1431 = vst [vmem:[#allocation2 + $0x80] sm:$0xff] %v4249_v10  ;;  %v1026_v63 = vmax.f32 %v972_v29, 0.0  ;;  %v2179_v22 = vld [vmem:[#allocation2 + $0x69] sm:$0xff]  ;;  %v2385_v0 = vmul.f32 %v4140_v19, %v2346_v56  ;;  %v2116_v12 = vmul.f32 %v4065_v27, %v4231_v48  ;;  %v2117_v14 = vmul.f32 %v4065_v27, %v4249_v10 }
 0x130   : > { %v2279_v30 = vld [vmem:[#allocation2 + $0x6a] sm:$0xff]  ;;  %v744_v26 = vpop.f32.mrb[36].mxu0  ;;  %3601 = vmatmul.mubr.bf16.vlgmr.msra.gmra.mrb[20].mxu1 %v2485_v15  ;;  %v2215_v39 = vmul.f32 %v4067_v28, %v2179_v22  ;;  %v1916_v38 = vmul.f32 %v2179_v22, %v4055_v13  ;;  %v1947_v23 = vadd.f32 %v1915_v2, %v1847_v16  ;;  %v1516_v62 = vmul.f32 %v4025_v46, %v4191_v25 }
 0x131   : > { %v2315_v32 = vmul.f32 %v4071_v33, %v2279_v30  ;;  %v1378_v49 = vsel %vm1198_vm4, %v1026_v63, 0.0  ;;  %v912_v54 = vmul.f32 %v4010_v36, %v744_v26  ;;  %v3514_v55 = vpop.f32.mrb[37].mxu0  ;;  %v2424_v57 = vadd.f32 %v4152_v31, %v2385_v0 }
 0x132   : > { %v2016_v50 = vmul.f32 %v2279_v30, %v4061_v21  ;;  %1432 = vst [vmem:[#allocation2 + $0x88] sm:$0xff] %v1378_v49  ;;  %v747_v58 = vpop.f32.mrb[38].mxu0  ;;  %v2247_v61 = vadd.f32 %v2215_v39, %v2147_v42  ;;  %v1948_v24 = vadd.f32 %v1916_v38, %v1848_v17  ;;  %v2047_v11 = vadd.f32 %v2015_v59, %v1947_v23 }
 0x133   : > { %v973_v44 = vadd.f32 %v4017_v40, %v912_v54  ;;  %v913_v3 = vmul.f32 %v4010_v36, %v747_v58  ;;  %v3515_v52 = vpop.f32.mrb[39].mxu0  ;;  %v2456_v6 = vmax.f32 %v2424_v57, 0.0  ;;  %v1517_v5 = vmul.f32 %v4025_v46, %v4193_v37 }
 0x134   : > { %v2347_v53 = vadd.f32 %v2315_v32, %v2247_v61  ;;  %v2048_v7 = vadd.f32 %v2016_v50, %v1948_v24  ;;  %v2148_v8 = vadd.f32 %v2116_v12, %v2047_v11  ;;  %v1616_v42 = vmul.f32 %v4223_v35, %v4027_v47 }
 0x135   : > { %v1027_v9 = vmax.f32 %v973_v44, 0.0  ;;  %v974_v29 = vadd.f32 %v4017_v40, %v913_v3  ;;  %v1617_v25 = vmul.f32 %v2179_v22, %v4027_v47  ;;  %v1716_v56 = vmul.f32 %v4225_v45, %v4030_v51 }
 0x136   : > { %v2386_v2 = vmul.f32 %v4140_v19, %v2347_v53  ;;  %v2149_v15 = vadd.f32 %v2117_v14, %v2048_v7  ;;  %v4283_v16 = vld [vmem:[#allocation2 + $0x79] sm:$0xff]  ;;  %v1648_v17 = vadd.f32 %v1616_v42, %v1516_v62  ;;  %v1717_v59 = vmul.f32 %v2279_v30, %v4030_v51 }
 0x137   : > { %v4285_v37 = vld [vmem:[#allocation2 + $0x7a] sm:$0xff]  ;;  %v4290_v35 = vsel %vm1139_vm3, %v1027_v9, 0.0  ;;  %v4292_v63 = vmax.f32 %v974_v29, 0.0  ;;  %v2216_v22 = vmul.f32 %v4067_v28, %v4283_v16  ;;  %v1649_v14 = vadd.f32 %v1617_v25, %v1517_v5 }
 0x138   : > { %v2316_v45 = vmul.f32 %v4071_v33, %v4285_v37  ;;  %1433 = vst [vmem:[#allocation2 + $0x90] sm:$0xff] %v4290_v35  ;;  %v752_v0 = vpop.f32.mrb[40].mxu0  ;;  %v2425_v12 = vadd.f32 %v4152_v31, %v2386_v2  ;;  %v1748_v26 = vadd.f32 %v1716_v56, %v1648_v17  ;;  %v1817_v30 = vmul.f32 %v4046_v4, %v4231_v48 }
 0x139   : > { %1434 = vst [vmem:[#allocation2 + $0x98] sm:$0xff] %v4292_v63  ;;  %v914_v39 = vmul.f32 %v4010_v36, %v752_v0  ;;  %v3518_v32 = vpop.f32.mrb[41].mxu0  ;;  %v2181_v38 = vld [vmem:[#allocation2 + $0x81] sm:$0xff]  ;;  %v2248_v23 = vadd.f32 %v2216_v22, %v2148_v8  ;;  %v1818_v54 = vmul.f32 %v4046_v4, %v4249_v10  ;;  %v1917_v55 = vmul.f32 %v4283_v16, %v4055_v13 }
 0x13a   : > { %v2281_v49 = vld [vmem:[#allocation2 + $0x82] sm:$0xff]  ;;  %v755_v57 = vpop.f32.mrb[42].mxu0  ;;  %v2457_v50 = vmax.f32 %v2425_v12, 0.0  ;;  %v2217_v58 = vmul.f32 %v4067_v28, %v2181_v38  ;;  %v1749_v24 = vadd.f32 %v1717_v59, %v1649_v14  ;;  %v1849_v52 = vadd.f32 %v1817_v30, %v1748_v26 }
 0x13b   : > { %v2317_v61 = vmul.f32 %v4071_v33, %v2281_v49  ;;  %v975_v11 = vadd.f32 %v4017_v40, %v914_v39  ;;  %v915_v62 = vmul.f32 %v4010_v36, %v755_v57  ;;  %v3519_v44 = vpop.f32.mrb[43].mxu0  ;;  %v2348_v3 = vadd.f32 %v2316_v45, %v2248_v23 }
 0x13c   : > { %v2486_v5 = vpack.c.bf16 %v2457_v50, %v2456_v6  ;;  %v2249_v53 = vadd.f32 %v2217_v58, %v2149_v15  ;;  %v1850_v7 = vadd.f32 %v1818_v54, %v1749_v24  ;;  %v1918_v8 = vmul.f32 %v2181_v38, %v4055_v13 }
 0x13d   : > { %v1029_v42 = vmax.f32 %v975_v11, 0.0  ;;  %v976_v9 = vadd.f32 %v4017_v40, %v915_v62  ;;  %v2387_v29 = vmul.f32 %v4140_v19, %v2348_v3  ;;  %v1949_v25 = vadd.f32 %v1917_v55, %v1849_v52 }
 0x13e   : > { %3604 = vmatprep.mubr.bf16.mxu1 %v2486_v5  ;;  %v2349_v56 = vadd.f32 %v2317_v61, %v2249_v53  ;;  %v1950_v2 = vadd.f32 %v1918_v8, %v1850_v7  ;;  %v2017_v17 = vmul.f32 %v4285_v37, %v4061_v21  ;;  %v2018_v59 = vmul.f32 %v2281_v49, %v4061_v21 }
 0x13f   : > { %v1381_v6 = vsel %vm1198_vm4, %v1029_v42, 0.0  ;;  %v1030_v15 = vmax.f32 %v976_v9, 0.0  ;;  %v2426_v22 = vadd.f32 %v4152_v31, %v2387_v29  ;;  %v2118_v45 = vmul.f32 %v4065_v27, %v4290_v35 }
 0x140   : > { %1435 = vst [vmem:[#allocation2 + $0xa0] sm:$0xff] %v1381_v6  ;;  %v760_v0 = vpop.f32.mrb[44].mxu0  ;;  %v2388_v12 = vmul.f32 %v4140_v19, %v2349_v56  ;;  %v2049_v14 = vadd.f32 %v2017_v17, %v1949_v25  ;;  %v2050_v26 = vadd.f32 %v2018_v59, %v1950_v2  ;;  %v2119_v30 = vmul.f32 %v4065_v27, %v4292_v63  ;;  %v4326_v39 = vld [vmem:[#allocation2 + $0x91] sm:$0xff] }
 0x141   : > { %v4328_v32 = vld [vmem:[#allocation2 + $0x92] sm:$0xff]  ;;  %v4332_v23 = vsel %vm1139_vm3, %v1030_v15, 0.0  ;;  %v916_v54 = vmul.f32 %v4010_v36, %v760_v0  ;;  %v3522_v55 = vpop.f32.mrb[45].mxu0  ;;  %v2458_v57 = vmax.f32 %v2426_v22, 0.0  ;;  %v2218_v50 = vmul.f32 %v4067_v28, %v4326_v39 }
 0x142   : > { %1436 = vst [vmem:[#allocation2 + $0xa8] sm:$0xff] %v4332_v23  ;;  %v763_v58 = vpop.f32.mrb[46].mxu0  ;;  %v2427_v61 = vadd.f32 %v4152_v31, %v2388_v12  ;;  %v2150_v24 = vadd.f32 %v2118_v45, %v2049_v14  ;;  %v2151_v11 = vadd.f32 %v2119_v30, %v2050_v26  ;;  %v2318_v62 = vmul.f32 %v4071_v33, %v4328_v32 }
 0x143   : > { %v977_v44 = vadd.f32 %v4017_v40, %v916_v54  ;;  %v917_v3 = vmul.f32 %v4010_v36, %v763_v58  ;;  %v3523_v52 = vpop.f32.mrb[47].mxu0  ;;  %v1518_v5 = vmul.f32 %v4025_v46, %v4231_v48  ;;  %v1519_v53 = vmul.f32 %v4025_v46, %v4249_v10 }
 0x144   : > { %v2459_v7 = vmax.f32 %v2427_v61, 0.0  ;;  %v2250_v8 = vadd.f32 %v2218_v50, %v2150_v24  ;;  %v1618_v42 = vmul.f32 %v4283_v16, %v4027_v47  ;;  %v1619_v9 = vmul.f32 %v2181_v38, %v4027_v47 }
 0x145   : > { %v4350_v29 = vmax.f32 %v977_v44, 0.0  ;;  %v978_v25 = vadd.f32 %v4017_v40, %v917_v3  ;;  %v1718_v56 = vmul.f32 %v4285_v37, %v4030_v51  ;;  %v1719_v2 = vmul.f32 %v2281_v49, %v4030_v51 }
 0x146   : > { %v2487_v48 = vpack.c.bf16 %v2459_v7, %v2458_v57  ;;  %v2350_v17 = vadd.f32 %v2318_v62, %v2250_v8  ;;  %v1650_v59 = vadd.f32 %v1618_v42, %v1518_v5  ;;  %v1651_v10 = vadd.f32 %v1619_v9, %v1519_v53 }
 0x147   : > { %1437 = vst [vmem:[#allocation2 + $0xb0] sm:$0xff] %v4350_v29  ;;  %v1032_v6 = vmax.f32 %v978_v25, 0.0  ;;  %v2183_v15 = vld [vmem:[#allocation2 + $0x99] sm:$0xff]  ;;  %v1819_v38 = vmul.f32 %v4046_v4, %v4290_v35  ;;  %v1820_v22 = vmul.f32 %v4046_v4, %v4292_v63  ;;  %v1919_v37 = vmul.f32 %v4326_v39, %v4055_v13 }
 0x148   : > { %v4357_v16 = vld [vmem:[#allocation2 + $0x9a] sm:$0xff]  ;;  %v768_v49 = vpop.f32.mrb[48].mxu0  ;;  %3605 = vmatmul.mubr.bf16.gmra.mrb[24].mxu1 %v2487_v48  ;;  %v2219_v45 = vmul.f32 %v4067_v28, %v2183_v15  ;;  %v2389_v12 = vmul.f32 %v4140_v19, %v2350_v17  ;;  %v1750_v14 = vadd.f32 %v1718_v56, %v1650_v59  ;;  %v1751_v55 = vadd.f32 %v1719_v2, %v1651_v10 }
 0x149   : > { %v2319_v0 = vmul.f32 %v4071_v33, %v4357_v16  ;;  %v1384_v26 = vsel %vm1198_vm4, %v1032_v6, 0.0  ;;  %v918_v30 = vmul.f32 %v4010_v36, %v768_v49  ;;  %v3526_v54 = vpop.f32.mrb[49].mxu0  ;;  %v1920_v57 = vmul.f32 %v2183_v15, %v4055_v13 }
 0x14a   : > { %1438 = vst [vmem:[#allocation2 + $0xb8] sm:$0xff] %v1384_v26  ;;  %v771_v50 = vpop.f32.mrb[50].mxu0  ;;  %v2251_v58 = vadd.f32 %v2219_v45, %v2151_v11  ;;  %v2428_v61 = vadd.f32 %v4152_v31, %v2389_v12  ;;  %v1851_v24 = vadd.f32 %v1819_v38, %v1750_v14  ;;  %v2019_v62 = vmul.f32 %v4328_v32, %v4061_v21 }
 0x14b   : > { %v979_v44 = vadd.f32 %v4017_v40, %v918_v30  ;;  %v919_v3 = vmul.f32 %v4010_v36, %v771_v50  ;;  %v3527_v52 = vpop.f32.mrb[51].mxu0  ;;  %v1852_v5 = vadd.f32 %v1820_v22, %v1751_v55  ;;  %v2020_v53 = vmul.f32 %v4357_v16, %v4061_v21 }
 0x14c   : > { %v2351_v7 = vadd.f32 %v2319_v0, %v2251_v58  ;;  %v2460_v8 = vmax.f32 %v2428_v61, 0.0  ;;  %v1951_v42 = vadd.f32 %v1919_v37, %v1851_v24  ;;  %v2120_v11 = vmul.f32 %v4065_v27, %v4332_v23 }
 0x14d   : > { %v1033_v9 = vmax.f32 %v979_v44, 0.0  ;;  %v980_v25 = vadd.f32 %v4017_v40, %v919_v3  ;;  %v1952_v56 = vadd.f32 %v1920_v57, %v1852_v5  ;;  %v2121_v2 = vmul.f32 %v4065_v27, %v4350_v29 }
 0x14e   : > { %v2390_v48 = vmul.f32 %v4140_v19, %v2351_v7  ;;  %v2051_v17 = vadd.f32 %v2019_v62, %v1951_v42  ;;  %v4386_v59 = vld [vmem:[#allocation2 + $0xa9] sm:$0xff]  ;;  %v1520_v6 = vmul.f32 %v4025_v46, %v4290_v35  ;;  %v1521_v38 = vmul.f32 %v4025_v46, %v4292_v63 }
 0x14f   : > { %v4388_v10 = vld [vmem:[#allocation2 + $0xaa] sm:$0xff]  ;;  %v4396_v22 = vsel %vm1139_vm3, %v1033_v9, 0.0  ;;  %v4398_v37 = vmax.f32 %v980_v25, 0.0  ;;  %v2052_v49 = vadd.f32 %v2020_v53, %v1952_v56  ;;  %v2220_v45 = vmul.f32 %v4067_v28, %v4386_v59 }
 0x150   : > { %1439 = vst [vmem:[#allocation2 + $0xc0] sm:$0xff] %v4396_v22  ;;  %v776_v0 = vpop.f32.mrb[52].mxu0  ;;  %v2429_v12 = vadd.f32 %v4152_v31, %v2390_v48  ;;  %v2152_v14 = vadd.f32 %v2120_v11, %v2051_v17  ;;  %v2320_v35 = vmul.f32 %v4071_v33, %v4388_v10  ;;  %v1620_v63 = vmul.f32 %v4326_v39, %v4027_v47 }
 0x151   : > { %1440 = vst [vmem:[#allocation2 + $0xc8] sm:$0xff] %v4398_v37  ;;  %v920_v26 = vmul.f32 %v4010_v36, %v776_v0  ;;  %v3530_v30 = vpop.f32.mrb[53].mxu0  ;;  %v2153_v54 = vadd.f32 %v2121_v2, %v2052_v49  ;;  %v4410_v55 = vld [vmem:[#allocation2 + $0xb1] sm:$0xff]  ;;  %v1621_v50 = vmul.f32 %v2183_v15, %v4027_v47  ;;  %v1720_v58 = vmul.f32 %v4328_v32, %v4030_v51 }
 0x152   : > { %v4412_v57 = vld [vmem:[#allocation2 + $0xb2] sm:$0xff]  ;;  %v779_v61 = vpop.f32.mrb[54].mxu0  ;;  %v2461_v24 = vmax.f32 %v2429_v12, 0.0  ;;  %v2221_v39 = vmul.f32 %v4067_v28, %v4410_v55  ;;  %v2252_v62 = vadd.f32 %v2220_v45, %v2152_v14  ;;  %v1652_v53 = vadd.f32 %v1620_v63, %v1520_v6  ;;  %v4446_v63 = vld [vmem:[%s5329_s2] ss:$0 sm:$0xff] }
 0x153   : > { %v2321_v44 = vmul.f32 %v4071_v33, %v4412_v57  ;;  %v981_v3 = vadd.f32 %v4017_v40, %v920_v26  ;;  %v921_v52 = vmul.f32 %v4010_v36, %v779_v61  ;;  %v3531_v5 = vpop.f32.mrb[55].mxu0  ;;  %v1653_v7 = vadd.f32 %v1621_v50, %v1521_v38 }
 0x154   : > { %v2488_v15 = vpack.c.bf16 %v2461_v24, %v2460_v8  ;;  %v2253_v42 = vadd.f32 %v2221_v39, %v2153_v54  ;;  %v2352_v11 = vadd.f32 %v2320_v35, %v2252_v62  ;;  %v1721_v32 = vmul.f32 %v4357_v16, %v4030_v51 }
 0x155   : > { %v1035_v9 = vmax.f32 %v981_v3, 0.0  ;;  %v982_v25 = vadd.f32 %v4017_v40, %v921_v52  ;;  %v1752_v56 = vadd.f32 %v1720_v58, %v1652_v53  ;;  %v1821_v2 = vmul.f32 %v4046_v4, %v4332_v23  ;;  %v4462_v52 = vld [vmem:[%s5330_s3] ss:$0 sm:$0xff] }
 0x156   : > { %3608 = vmatprep.mubr.bf16.mxu1 %v2488_v15  ;;  %v2353_v48 = vadd.f32 %v2321_v44, %v2253_v42  ;;  %v2391_v36 = vmul.f32 %v4140_v19, %v2352_v11  ;;  %v1753_v17 = vadd.f32 %v1721_v32, %v1653_v7  ;;  %v1822_v8 = vmul.f32 %v4046_v4, %v4350_v29 }
 0x157   : > { %v1387_v6 = vsel %vm1198_vm4, %v1035_v9, 0.0  ;;  %v1036_v38 = vmax.f32 %v982_v25, 0.0  ;;  %v1853_v16 = vadd.f32 %v1821_v2, %v1752_v56  ;;  %v1921_v40 = vmul.f32 %v4386_v59, %v4055_v13 }
 0x158   : > { %1441 = vst [vmem:[#allocation2 + $0xd0] sm:$0xff] %v1387_v6  ;;  %v784_v49 = vpop.f32.mrb[56].mxu0  ;;  %v2392_v45 = vmul.f32 %v4140_v19, %v2353_v48  ;;  %v2430_v0 = vadd.f32 %v4152_v31, %v2391_v36  ;;  %v1854_v12 = vadd.f32 %v1822_v8, %v1753_v17  ;;  %v1922_v14 = vmul.f32 %v4410_v55, %v4055_v13  ;;  %v4451_v58 = vld [vmem:[#allocation2 + $0xc1] sm:$0xff] }
 0x159   : > { %v4441_v35 = vsel %vm1139_vm3, %v1036_v38, 0.0  ;;  %v922_v26 = vmul.f32 %v4446_v63, %v784_v49  ;;  %v3534_v30 = vpop.f32.mrb[57].mxu0  ;;  %v1953_v54 = vadd.f32 %v1921_v40, %v1853_v16  ;;  %v2021_v50 = vmul.f32 %v4388_v10, %v4061_v21  ;;  %v4457_v3 = vld [vmem:[#allocation2 + $0xc2] sm:$0xff] }
 0x15a   : > { %1442 = vst [vmem:[#allocation2 + $0xd8] sm:$0xff] %v4441_v35  ;;  %v787_v61 = vpop.f32.mrb[58].mxu0  ;;  %v2431_v24 = vadd.f32 %v4152_v31, %v2392_v45  ;;  %v2462_v39 = vmax.f32 %v2430_v0, 0.0  ;;  %v1954_v62 = vadd.f32 %v1922_v14, %v1854_v12  ;;  %v2022_v44 = vmul.f32 %v4412_v57, %v4061_v21 }
 0x15b   : > { %v983_v5 = vadd.f32 %v4462_v52, %v922_v26  ;;  %v923_v53 = vmul.f32 %v4446_v63, %v787_v61  ;;  %v3535_v7 = vpop.f32.mrb[59].mxu0  ;;  %v2053_v15 = vadd.f32 %v2021_v50, %v1953_v54  ;;  %v2122_v42 = vmul.f32 %v4065_v27, %v4396_v22 }
 0x15c   : > { %v2463_v11 = vmax.f32 %v2431_v24, 0.0  ;;  %v2054_v32 = vadd.f32 %v2022_v44, %v1954_v62  ;;  %v2123_v9 = vmul.f32 %v4065_v27, %v4398_v37  ;;  %v2222_v25 = vmul.f32 %v4067_v28, %v4451_v58 }
 0x15d   : > { %v4472_v56 = vmax.f32 %v983_v5, 0.0  ;;  %v984_v2 = vadd.f32 %v4462_v52, %v923_v53  ;;  %v2154_v48 = vadd.f32 %v2122_v42, %v2053_v15  ;;  %v2322_v36 = vmul.f32 %v4071_v33, %v4457_v3 }
 0x15e   : > { %v2489_v17 = vpack.c.bf16 %v2463_v11, %v2462_v39  ;;  %v2155_v8 = vadd.f32 %v2123_v9, %v2054_v32  ;;  %v1522_v6 = vmul.f32 %v4025_v46, %v4332_v23  ;;  %v1523_v38 = vmul.f32 %v4025_v46, %v4350_v29 }
 0x15f   : > { %1443 = vst [vmem:[#allocation2 + $0xe0] sm:$0xff] %v4472_v56  ;;  %v1038_v16 = vmax.f32 %v984_v2, 0.0  ;;  %v4482_v40 = vld [vmem:[#allocation2 + $0xc9] sm:$0xff]  ;;  %v2254_v49 = vadd.f32 %v2222_v25, %v2154_v48  ;;  %v1622_v0 = vmul.f32 %v4386_v59, %v4027_v47  ;;  %v1623_v12 = vmul.f32 %v4410_v55, %v4027_v47 }
 0x160   : > { %v4484_v45 = vld [vmem:[#allocation2 + $0xca] sm:$0xff]  ;;  %v792_v14 = vpop.f32.mrb[60].mxu0  ;;  %3609 = vmatmul.mubr.bf16.gmra.mrb[28].mxu1 %v2489_v17  ;;  %v2223_v23 = vmul.f32 %v4067_v28, %v4482_v40  ;;  %v1722_v26 = vmul.f32 %v4388_v10, %v4030_v51  ;;  %v1723_v30 = vmul.f32 %v4412_v57, %v4030_v51  ;;  %v1823_v44 = vmul.f32 %v4046_v4, %v4396_v22 }
 0x161   : > { %v2323_v29 = vmul.f32 %v4071_v33, %v4484_v45  ;;  %v1390_v59 = vsel %vm1198_vm4, %v1038_v16, 0.0  ;;  %v924_v54 = vmul.f32 %v4446_v63, %v792_v14  ;;  %v3538_v55 = vpop.f32.mrb[61].mxu0  ;;  %v2354_v50 = vadd.f32 %v2322_v36, %v2254_v49 }
 0x162   : > { %v1654_v61 = vadd.f32 %v1622_v0, %v1522_v6  ;;  %1444 = vst [vmem:[#allocation2 + $0xe8] sm:$0xff] %v1390_v59  ;;  %v795_v24 = vpop.f32.mrb[62].mxu0  ;;  %v2255_v39 = vadd.f32 %v2223_v23, %v2155_v8  ;;  %v1655_v62 = vadd.f32 %v1623_v12, %v1523_v38  ;;  %v1824_v10 = vmul.f32 %v4046_v4, %v4398_v37 }
 0x163   : > { %v985_v57 = vadd.f32 %v4462_v52, %v924_v54  ;;  %v925_v5 = vmul.f32 %v4446_v63, %v795_v24  ;;  %v3539_v53 = vpop.f32.mrb[63].mxu0  ;;  %v2393_v7 = vmul.f32 %v4140_v19, %v2354_v50  ;;  %v1923_v32 = vmul.f32 %v4451_v58, %v4055_v13 }
 0x164   : > { %v1754_v15 = vadd.f32 %v1722_v26, %v1654_v61  ;;  %v2355_v42 = vadd.f32 %v2323_v29, %v2255_v39  ;;  %v1755_v11 = vadd.f32 %v1723_v30, %v1655_v62  ;;  %v1924_v9 = vmul.f32 %v4482_v40, %v4055_v13 }
 0x165   : > { %v1039_v25 = vmax.f32 %v985_v57, 0.0  ;;  %v986_v2 = vadd.f32 %v4462_v52, %v925_v5  ;;  %v2432_v48 = vadd.f32 %v4152_v31, %v2393_v7  ;;  %v2023_v6 = vmul.f32 %v4457_v3, %v4061_v21 }
 0x166   : > { %v1855_v36 = vadd.f32 %v1823_v44, %v1754_v15  ;;  %v2394_v17 = vmul.f32 %v4140_v19, %v2355_v42  ;;  %v1856_v8 = vadd.f32 %v1824_v10, %v1755_v11  ;;  %v2024_v38 = vmul.f32 %v4484_v45, %v4061_v21  ;;  %v4519_v16 = vld [vmem:[#allocation2 + $0xd9] sm:$0xff] }
 0x167   : > { %v4521_v49 = vld [vmem:[#allocation2 + $0xda] sm:$0xff]  ;;  %v4525_v0 = vsel %vm1139_vm3, %v1039_v25, 0.0  ;;  %v4527_v12 = vmax.f32 %v986_v2, 0.0  ;;  %v2464_v14 = vmax.f32 %v2432_v48, 0.0  ;;  %v2124_v59 = vmul.f32 %v4065_v27, %v4441_v35 }
 0x168   : > { %v1955_v23 = vadd.f32 %v1923_v32, %v1855_v36  ;;  %1445 = vst [vmem:[#allocation2 + $0xf0] sm:$0xff] %v4525_v0  ;;  %v800_v29 = vpop.f32.mrb[64].mxu0  ;;  %v2433_v26 = vadd.f32 %v4152_v31, %v2394_v17  ;;  %v1956_v30 = vadd.f32 %v1924_v9, %v1856_v8  ;;  %v2125_v54 = vmul.f32 %v4065_v27, %v4472_v56 }
 0x169   : > { %1446 = vst [vmem:[#allocation2 + $0xf8] sm:$0xff] %v4527_v12  ;;  %v926_v55 = vmul.f32 %v4446_v63, %v800_v29  ;;  %v3542_v50 = vpop.f32.mrb[65].mxu0  ;;  %v4537_v24 = vld [vmem:[#allocation2 + $0xe1] sm:$0xff]  ;;  %v2224_v39 = vmul.f32 %v4067_v28, %v4519_v16  ;;  %v2324_v44 = vmul.f32 %v4071_v33, %v4521_v49  ;;  %v1408_v9 = vsel %vm1198_vm4, %v1056_v18, 0.0 }
 0x16a   : > { %v2055_v61 = vadd.f32 %v2023_v6, %v1955_v23  ;;  %v4541_v62 = vld [vmem:[#allocation2 + $0xe2] sm:$0xff]  ;;  %v803_v10 = vpop.f32.mrb[66].mxu0  ;;  %v2465_v57 = vmax.f32 %v2433_v26, 0.0  ;;  %v2056_v5 = vadd.f32 %v2024_v38, %v1956_v30  ;;  %v2225_v53 = vmul.f32 %v4067_v28, %v4537_v24  ;;  %1462 = vst [vmem:[#allocation2 + $0x178] sm:$0xff] %v1408_v9 }
 0x16b   : > { %v2325_v7 = vmul.f32 %v4071_v33, %v4541_v62  ;;  %v987_v15 = vadd.f32 %v4462_v52, %v926_v55  ;;  %v927_v42 = vmul.f32 %v4446_v63, %v803_v10  ;;  %v3543_v11 = vpop.f32.mrb[67].mxu0  ;;  %v1057_v48 = vmax.f32 %v4180_v20, 0.0 }
 0x16c   : > { %v2156_v32 = vadd.f32 %v2124_v59, %v2055_v61  ;;  %v2490_v25 = vpack.c.bf16 %v2465_v57, %v2464_v14  ;;  %v2157_v2 = vadd.f32 %v2125_v54, %v2056_v5  ;;  %v1004_v36 = vadd.f32 %v4462_v52, %v4187_v1 }
 0x16d   : > { %v1041_v17 = vmax.f32 %v987_v15, 0.0  ;;  %v988_v8 = vadd.f32 %v4462_v52, %v927_v42  ;;  %v1524_v38 = vmul.f32 %v4025_v46, %v4396_v22  ;;  %v4563_v18 = vsel %vm1139_vm3, %v1057_v48, 0.0 }
 0x16e   : > { %v2256_v6 = vadd.f32 %v2224_v39, %v2156_v32  ;;  %3612 = vmatprep.mubr.bf16.mxu1 %v2490_v25  ;;  %v2257_v41 = vadd.f32 %v2225_v53, %v2157_v2  ;;  %v4565_v14 = vmax.f32 %v1004_v36, 0.0  ;;  %v1525_v20 = vmul.f32 %v4025_v46, %v4398_v37  ;;  %1463 = vst [vmem:[#allocation2 + $0x180] sm:$0xff] %v4563_v18 }
 0x16f   : > { %v1393_v1 = vsel %vm1198_vm4, %v1041_v17, 0.0  ;;  %v1042_v23 = vmax.f32 %v988_v8, 0.0  ;;  %v1624_v22 = vmul.f32 %v4451_v58, %v4027_v47  ;;  %v1625_v59 = vmul.f32 %v4482_v40, %v4027_v47 }
 0x170   : > { %v2356_v29 = vadd.f32 %v2324_v44, %v2256_v6  ;;  %1447 = vst [vmem:[#allocation2 + $0x100] sm:$0xff] %v1393_v1  ;;  %v808_v26 = vpop.f32.mrb[68].mxu0  ;;  %v2357_v30 = vadd.f32 %v2325_v7, %v2257_v41  ;;  %1464 = vst [vmem:[#allocation2 + $0x188] sm:$0xff] %v4565_v14  ;;  %v1724_v37 = vmul.f32 %v4457_v3, %v4030_v51  ;;  %v4604_v36 = vld [vmem:[#allocation2 + $0xf1] sm:$0xff] }
 0x171   : > { %v1725_v54 = vmul.f32 %v4484_v45, %v4030_v51  ;;  %v4583_v55 = vsel %vm1139_vm3, %v1042_v23, 0.0  ;;  %v928_v58 = vmul.f32 %v4446_v63, %v808_v26  ;;  %v3546_v50 = vpop.f32.mrb[69].mxu0  ;;  %v1656_v39 = vadd.f32 %v1624_v22, %v1524_v38  ;;  %v4610_v38 = vld [vmem:[#allocation2 + $0xf2] sm:$0xff] }
 0x172   : > { %v2395_v61 = vmul.f32 %v4140_v19, %v2356_v29  ;;  %1448 = vst [vmem:[#allocation2 + $0x108] sm:$0xff] %v4583_v55  ;;  %v811_v44 = vpop.f32.mrb[70].mxu0  ;;  %v2396_v40 = vmul.f32 %v4140_v19, %v2357_v30  ;;  %v1657_v10 = vadd.f32 %v1625_v59, %v1525_v20  ;;  %v1825_v3 = vmul.f32 %v4046_v4, %v4441_v35 }
 0x173   : > { %v1826_v45 = vmul.f32 %v4046_v4, %v4472_v56  ;;  %v989_v57 = vadd.f32 %v4462_v52, %v928_v58  ;;  %v929_v5 = vmul.f32 %v4446_v63, %v811_v44  ;;  %v3547_v53 = vpop.f32.mrb[71].mxu0  ;;  %v1756_v15 = vadd.f32 %v1724_v37, %v1656_v39  ;;  %v880_v58 = vpop.f32.mrb[16].mxu1 }
 0x174   : > { %v2434_v7 = vadd.f32 %v4152_v31, %v2395_v61  ;;  %v2435_v42 = vadd.f32 %v4152_v31, %v2396_v40  ;;  %v1757_v11 = vadd.f32 %v1725_v54, %v1657_v10  ;;  %v1925_v19 = vmul.f32 %v4519_v16, %v4055_v13  ;;  %v3582_v10 = vpop.f32.mrb[17].mxu1  ;;  %v3706_v53 = vld [vmem:[%s5337_s10] sm:$0x3] }
 0x175   : > { %v1926_v32 = vmul.f32 %v4537_v24, %v4055_v13  ;;  %v4601_v9 = vmax.f32 %v989_v57, 0.0  ;;  %v990_v25 = vadd.f32 %v4462_v52, %v929_v5  ;;  %v1857_v48 = vadd.f32 %v1825_v3, %v1756_v15  ;;  %v883_v15 = vpop.f32.mrb[18].mxu1 }
 0x176   : > { %v2466_v2 = vmax.f32 %v2434_v7, 0.0  ;;  %v2467_v17 = vmax.f32 %v2435_v42, 0.0  ;;  %v1858_v8 = vadd.f32 %v1826_v45, %v1757_v11  ;;  %v2025_v31 = vmul.f32 %v4521_v49, %v4061_v21 }
 0x177   : > { %v2026_v6 = vmul.f32 %v4541_v62, %v4061_v21  ;;  %1449 = vst [vmem:[#allocation2 + $0x110] sm:$0xff] %v4601_v9  ;;  %v1044_v41 = vmax.f32 %v990_v25, 0.0  ;;  %v1957_v20 = vadd.f32 %v1925_v19, %v1857_v48  ;;  %v2126_v1 = vmul.f32 %v4065_v27, %v4525_v0  ;;  %v4617_v29 = vld [vmem:[#allocation2 + $0xf9] sm:$0xff] }
 0x178   : > { %v2127_v23 = vmul.f32 %v4065_v27, %v4527_v12  ;;  %v4619_v22 = vld [vmem:[#allocation2 + $0xfa] sm:$0xff]  ;;  %v816_v26 = vpop.f32.mrb[72].mxu0  ;;  %v2491_v30 = vpack.c.bf16 %v2467_v17, %v2466_v2  ;;  %v1958_v59 = vadd.f32 %v1926_v32, %v1858_v8  ;;  %v2226_v37 = vmul.f32 %v4067_v28, %v4604_v36  ;;  %v3583_v2 = vpop.f32.mrb[19].mxu1 }
 0x179   : > { %v2227_v54 = vmul.f32 %v4067_v28, %v4617_v29  ;;  %v1396_v50 = vsel %vm1198_vm4, %v1044_v41, 0.0  ;;  %v930_v61 = vmul.f32 %v4446_v63, %v816_v26  ;;  %v3550_v39 = vpop.f32.mrb[73].mxu0  ;;  %v2057_v44 = vadd.f32 %v2025_v31, %v1957_v20 }
 0x17a   : > { %v2326_v40 = vmul.f32 %v4071_v33, %v4610_v38  ;;  %1450 = vst [vmem:[#allocation2 + $0x118] sm:$0xff] %v1396_v50  ;;  %3613 = vmatmul.mubr.bf16.gmra.mrb[32].mxu1 %v2491_v30  ;;  %v819_v3 = vpop.f32.mrb[74].mxu0  ;;  %v2058_v45 = vadd.f32 %v2026_v6, %v1958_v59  ;;  %v2327_v57 = vmul.f32 %v4071_v33, %v4619_v22  ;;  %v2904_v7 = vsel %vm634_vm0, %v3706_v53, 0  ;;  %v4668_v39 = vld [vmem:[%s5332_s5] ss:$0 sm:$0xff] }
 0x17b   : > { %v944_v5 = vmul.f32 %v4446_v63, %v4115_v43  ;;  %v991_v42 = vadd.f32 %v4462_v52, %v930_v61  ;;  %v931_v11 = vmul.f32 %v4446_v63, %v819_v3  ;;  %v3551_v19 = vpop.f32.mrb[75].mxu0  ;;  %v2158_v32 = vadd.f32 %v2126_v1, %v2057_v44  ;;  %3633 = vmatpush3.bf16.msra.mxu1 %v2904_v7 }
 0x17c   : > { %v1526_v25 = vmul.f32 %v4025_v46, %v4441_v35  ;;  %v2159_v48 = vadd.f32 %v2127_v23, %v2058_v45  ;;  %v1527_v17 = vmul.f32 %v4025_v46, %v4472_v56  ;;  %v1626_v8 = vmul.f32 %v4519_v16, %v4027_v47 }
 0x17d   : > { %v1005_v43 = vadd.f32 %v4462_v52, %v944_v5  ;;  %v1045_v31 = vmax.f32 %v991_v42, 0.0  ;;  %v992_v6 = vadd.f32 %v4462_v52, %v931_v11  ;;  %v2258_v41 = vadd.f32 %v2226_v37, %v2158_v32  ;;  %v4685_v42 = vld [vmem:[%s5333_s6] ss:$0 sm:$0xff] }
 0x17e   : > { %v1627_v20 = vmul.f32 %v4537_v24, %v4027_v47  ;;  %v2259_v1 = vadd.f32 %v2227_v54, %v2159_v48  ;;  %v1658_v35 = vadd.f32 %v1626_v8, %v1526_v25  ;;  %v1726_v23 = vmul.f32 %v4521_v49, %v4030_v51 }
 0x17f   : > { %v1059_v26 = vmax.f32 %v1005_v43, 0.0  ;;  %v4654_v30 = vsel %vm1139_vm3, %v1045_v31, 0.0  ;;  %v4656_v56 = vmax.f32 %v992_v6, 0.0  ;;  %v2358_v16 = vadd.f32 %v2326_v40, %v2258_v41  ;;  %v4693_v43 = vld [vmem:[#allocation2 + $0x109] sm:$0xff] }
 0x180   : > { %v1659_v59 = vadd.f32 %v1627_v20, %v1527_v17  ;;  %1451 = vst [vmem:[#allocation2 + $0x120] sm:$0xff] %v4654_v30  ;;  %v824_v37 = vpop.f32.mrb[76].mxu0  ;;  %v2359_v58 = vadd.f32 %v2327_v57, %v2259_v1  ;;  %v1727_v54 = vmul.f32 %v4541_v62, %v4030_v51  ;;  %v1758_v50 = vadd.f32 %v1726_v23, %v1658_v35  ;;  %v4698_v20 = vld [vmem:[#allocation2 + $0x10a] sm:$0xff] }
 0x181   : > { %v1411_v24 = vsel %vm1198_vm4, %v1059_v26, 0.0  ;;  %1452 = vst [vmem:[#allocation2 + $0x128] sm:$0xff] %v4656_v56  ;;  %v932_v49 = vmul.f32 %v4446_v63, %v824_v37  ;;  %v3554_v61 = vpop.f32.mrb[77].mxu0  ;;  %v2397_v44 = vmul.f32 %v4668_v39, %v2358_v16  ;;  %v1827_v40 = vmul.f32 %v4046_v4, %v4525_v0  ;;  %v4696_v41 = vld [vmem:[#allocation2 + $0x111] sm:$0xff] }
 0x182   : > { %1465 = vst [vmem:[#allocation2 + $0x190] sm:$0xff] %v1411_v24  ;;  %v1828_v62 = vmul.f32 %v4046_v4, %v4527_v12  ;;  %v827_v10 = vpop.f32.mrb[78].mxu0  ;;  %v2398_v3 = vmul.f32 %v4668_v39, %v2359_v58  ;;  %v1759_v45 = vadd.f32 %v1727_v54, %v1659_v59  ;;  %v1927_v57 = vmul.f32 %v4604_v36, %v4055_v13  ;;  %v4704_v16 = vld [vmem:[#allocation2 + $0x112] sm:$0xff] }
 0x183   : > { %v1928_v5 = vmul.f32 %v4617_v29, %v4055_v13  ;;  %v993_v53 = vadd.f32 %v4462_v52, %v932_v49  ;;  %v933_v7 = vmul.f32 %v4446_v63, %v827_v10  ;;  %v3555_v15 = vpop.f32.mrb[79].mxu0  ;;  %v2436_v11 = vadd.f32 %v4685_v42, %v2397_v44 }
 0x184   : > { %v1859_v19 = vadd.f32 %v1827_v40, %v1758_v50  ;;  %v2437_v32 = vadd.f32 %v4685_v42, %v2398_v3  ;;  %v1860_v25 = vadd.f32 %v1828_v62, %v1759_v45  ;;  %v2027_v2 = vmul.f32 %v4610_v38, %v4061_v21 }
 0x185   : > { %v2028_v48 = vmul.f32 %v4619_v22, %v4061_v21  ;;  %v1047_v17 = vmax.f32 %v993_v53, 0.0  ;;  %v994_v8 = vadd.f32 %v4462_v52, %v933_v7  ;;  %v2468_v31 = vmax.f32 %v2436_v11, 0.0 }
 0x186   : > { %v1959_v6 = vadd.f32 %v1927_v57, %v1859_v19  ;;  %v2469_v1 = vmax.f32 %v2437_v32, 0.0  ;;  %v1960_v26 = vadd.f32 %v1928_v5, %v1860_v25  ;;  %v2128_v35 = vmul.f32 %v4065_v27, %v4583_v55 }
 0x187   : > { %v2129_v23 = vmul.f32 %v4065_v27, %v4601_v9  ;;  %v1399_v59 = vsel %vm1198_vm4, %v1047_v17, 0.0  ;;  %v1048_v37 = vmax.f32 %v994_v8, 0.0  ;;  %v2228_v24 = vmul.f32 %v4067_v28, %v4693_v43 }
 0x188   : > { %v2059_v58 = vadd.f32 %v2027_v2, %v1959_v6  ;;  %1453 = vst [vmem:[#allocation2 + $0x130] sm:$0xff] %v1399_v59  ;;  %v2492_v54 = vpack.c.bf16 %v2469_v1, %v2468_v31  ;;  %v832_v50 = vpop.f32.mrb[80].mxu0  ;;  %v2060_v49 = vadd.f32 %v2028_v48, %v1960_v26  ;;  %v2229_v61 = vmul.f32 %v4067_v28, %v4696_v41 }
 0x189   : > { %v2328_v44 = vmul.f32 %v4071_v33, %v4698_v20  ;;  %v4716_v40 = vsel %vm1139_vm3, %v1048_v37, 0.0  ;;  %v934_v62 = vmul.f32 %v4446_v63, %v832_v50  ;;  %v3558_v10 = vpop.f32.mrb[81].mxu0  ;;  %v2329_v45 = vmul.f32 %v4071_v33, %v4704_v16 }
 0x18a   : > { %v2160_v3 = vadd.f32 %v2128_v35, %v2059_v58  ;;  %1454 = vst [vmem:[#allocation2 + $0x138] sm:$0xff] %v4716_v40  ;;  %3616 = vmatprep.mubr.bf16.mxu1 %v2492_v54  ;;  %v835_v57 = vpop.f32.mrb[82].mxu0  ;;  %v2161_v5 = vadd.f32 %v2129_v23, %v2060_v49  ;;  %v1528_v53 = vmul.f32 %v4025_v46, %v4525_v0 }
 0x18b   : > { %v1529_v7 = vmul.f32 %v4025_v46, %v4527_v12  ;;  %v1628_v15 = vmul.f32 %v4604_v36, %v4027_v47  ;;  %v995_v11 = vadd.f32 %v4462_v52, %v934_v62  ;;  %v935_v19 = vmul.f32 %v4446_v63, %v835_v57  ;;  %v3559_v32 = vpop.f32.mrb[83].mxu0 }
 0x18c   : > { %v2260_v25 = vadd.f32 %v2228_v24, %v2160_v3  ;;  %v1629_v2 = vmul.f32 %v4617_v29, %v4027_v47  ;;  %v2261_v48 = vadd.f32 %v2229_v61, %v2161_v5  ;;  %v1728_v0 = vmul.f32 %v4610_v38, %v4030_v51  ;;  %v4756_v3 = vld [vmem:[#allocation2 + $0x121] sm:$0xff] }
 0x18d   : > { %v1660_v17 = vadd.f32 %v1628_v15, %v1528_v53  ;;  %v1729_v12 = vmul.f32 %v4619_v22, %v4030_v51  ;;  %v4736_v8 = vmax.f32 %v995_v11, 0.0  ;;  %v996_v36 = vadd.f32 %v4462_v52, %v935_v19 }
 0x18e   : > { %v2360_v31 = vadd.f32 %v2328_v44, %v2260_v25  ;;  %v1661_v6 = vadd.f32 %v1629_v2, %v1529_v7  ;;  %v2361_v1 = vadd.f32 %v2329_v45, %v2261_v48  ;;  %v1829_v35 = vmul.f32 %v4046_v4, %v4583_v55  ;;  %v4767_v2 = vld [vmem:[#allocation2 + $0x122] sm:$0xff] }
 0x18f   : > { %v1760_v26 = vadd.f32 %v1728_v0, %v1660_v17  ;;  %v1830_v29 = vmul.f32 %v4046_v4, %v4601_v9  ;;  %1455 = vst [vmem:[#allocation2 + $0x140] sm:$0xff] %v4736_v8  ;;  %v1050_v38 = vmax.f32 %v996_v36, 0.0  ;;  %v1929_v59 = vmul.f32 %v4693_v43, %v4055_v13  ;;  %v4763_v7 = vld [vmem:[#allocation2 + $0x129] sm:$0xff] }
 0x190   : > { %v2399_v23 = vmul.f32 %v4668_v39, %v2360_v31  ;;  %v1761_v22 = vadd.f32 %v1729_v12, %v1661_v6  ;;  %v840_v37 = vpop.f32.mrb[84].mxu0  ;;  %v2400_v58 = vmul.f32 %v4668_v39, %v2361_v1  ;;  %v1930_v54 = vmul.f32 %v4696_v41, %v4055_v13  ;;  %v4769_v48 = vld [vmem:[#allocation2 + $0x12a] sm:$0xff] }
 0x191   : > { %v1861_v24 = vadd.f32 %v1829_v35, %v1760_v26  ;;  %v2029_v50 = vmul.f32 %v4698_v20, %v4061_v21  ;;  %v1402_v49 = vsel %vm1198_vm4, %v1050_v38, 0.0  ;;  %v936_v61 = vmul.f32 %v4446_v63, %v840_v37  ;;  %v3562_v62 = vpop.f32.mrb[85].mxu0 }
 0x192   : > { %v2438_v44 = vadd.f32 %v4685_v42, %v2399_v23  ;;  %v1862_v10 = vadd.f32 %v1830_v29, %v1761_v22  ;;  %1456 = vst [vmem:[#allocation2 + $0x148] sm:$0xff] %v1402_v49  ;;  %v2439_v45 = vadd.f32 %v4685_v42, %v2400_v58  ;;  %v843_v57 = vpop.f32.mrb[86].mxu0  ;;  %v2030_v53 = vmul.f32 %v4704_v16, %v4061_v21 }
 0x193   : > { %v1961_v5 = vadd.f32 %v1929_v59, %v1861_v24  ;;  %v2130_v60 = vmul.f32 %v4065_v27, %v4654_v30  ;;  %v997_v15 = vadd.f32 %v4462_v52, %v936_v61  ;;  %v937_v19 = vmul.f32 %v4446_v63, %v843_v57  ;;  %v3563_v32 = vpop.f32.mrb[87].mxu0 }
 0x194   : > { %v2470_v11 = vmax.f32 %v2438_v44, 0.0  ;;  %v1962_v25 = vadd.f32 %v1930_v54, %v1862_v10  ;;  %v2471_v17 = vmax.f32 %v2439_v45, 0.0  ;;  %v2131_v12 = vmul.f32 %v4065_v27, %v4656_v56 }
 0x195   : > { %v2061_v0 = vadd.f32 %v2029_v50, %v1961_v5  ;;  %v2230_v36 = vmul.f32 %v4067_v28, %v4756_v3  ;;  %v1051_v31 = vmax.f32 %v997_v15, 0.0  ;;  %v998_v6 = vadd.f32 %v4462_v52, %v937_v19 }
 0x196   : > { %v2062_v1 = vadd.f32 %v2030_v53, %v1962_v25  ;;  %v2231_v63 = vmul.f32 %v4067_v28, %v4763_v7  ;;  %v2493_v26 = vpack.c.bf16 %v2471_v17, %v2470_v11  ;;  %v2330_v29 = vmul.f32 %v4071_v33, %v4767_v2  ;;  %v4806_v62 = vld [vmem:[#allocation2 + $0x139] sm:$0xff] }
 0x197   : > { %v2162_v35 = vadd.f32 %v2130_v60, %v2061_v0  ;;  %v2331_v38 = vmul.f32 %v4071_v33, %v4769_v48  ;;  %v4784_v23 = vsel %vm1139_vm3, %v1051_v31, 0.0  ;;  %v4786_v22 = vmax.f32 %v998_v6, 0.0  ;;  %v4819_v15 = vld [vmem:[#allocation2 + $0x13a] sm:$0xff] }
 0x198   : > { %v2163_v59 = vadd.f32 %v2131_v12, %v2062_v1  ;;  %v1530_v52 = vmul.f32 %v4025_v46, %v4583_v55  ;;  %1457 = vst [vmem:[#allocation2 + $0x150] sm:$0xff] %v4784_v23  ;;  %3617 = vmatmul.mubr.bf16.gmra.mrb[36].mxu1 %v2493_v26  ;;  %v1531_v58 = vmul.f32 %v4025_v46, %v4601_v9 }
 0x199   : > { %v2262_v37 = vadd.f32 %v2230_v36, %v2162_v35  ;;  %v1630_v24 = vmul.f32 %v4693_v43, %v4027_v47  ;;  %v1631_v34 = vmul.f32 %v4696_v41, %v4027_v47  ;;  %1458 = vst [vmem:[#allocation2 + $0x158] sm:$0xff] %v4786_v22  ;;  %v1730_v50 = vmul.f32 %v4698_v20, %v4030_v51  ;;  %v4814_v45 = vld [vmem:[#allocation2 + $0x141] sm:$0xff] }
 0x19a   : > { %v2263_v54 = vadd.f32 %v2231_v63, %v2163_v59  ;;  %v1731_v55 = vmul.f32 %v4704_v16, %v4030_v51  ;;  %v1831_v49 = vmul.f32 %v4046_v4, %v4654_v30  ;;  %v1832_v43 = vmul.f32 %v4046_v4, %v4656_v56  ;;  %v4821_v11 = vld [vmem:[#allocation2 + $0x142] sm:$0xff] }
 0x19b   : > { %v2362_v61 = vadd.f32 %v2330_v29, %v2262_v37  ;;  %v1662_v9 = vadd.f32 %v1630_v24, %v1530_v52  ;;  %v1663_v44 = vadd.f32 %v1631_v34, %v1531_v58  ;;  %v1931_v10 = vmul.f32 %v4756_v3, %v4055_v13 }
 0x19c   : > { %v2363_v41 = vadd.f32 %v2331_v38, %v2263_v54  ;;  %v1932_v20 = vmul.f32 %v4763_v7, %v4055_v13  ;;  %v2031_v16 = vmul.f32 %v4767_v2, %v4061_v21  ;;  %v2032_v60 = vmul.f32 %v4769_v48, %v4061_v21 }
 0x19d   : > { %v2401_v57 = vmul.f32 %v4668_v39, %v2362_v61  ;;  %v1762_v5 = vadd.f32 %v1730_v50, %v1662_v9  ;;  %v1763_v53 = vadd.f32 %v1731_v55, %v1663_v44  ;;  %v2132_v32 = vmul.f32 %v4065_v27, %v4716_v40 }
 0x19e   : > { %v2402_v19 = vmul.f32 %v4668_v39, %v2363_v41  ;;  %v2133_v25 = vmul.f32 %v4065_v27, %v4736_v8  ;;  %v2232_v17 = vmul.f32 %v4067_v28, %v4806_v62  ;;  %v2233_v31 = vmul.f32 %v4067_v28, %v4814_v45 }
 0x19f   : > { %v2440_v0 = vadd.f32 %v4685_v42, %v2401_v57  ;;  %v1863_v12 = vadd.f32 %v1831_v49, %v1762_v5  ;;  %v1864_v36 = vadd.f32 %v1832_v43, %v1763_v53  ;;  %v2332_v1 = vmul.f32 %v4071_v33, %v4819_v15 }
 0x1a0   : > { %v2441_v6 = vadd.f32 %v4685_v42, %v2402_v19  ;;  %v2333_v63 = vmul.f32 %v4071_v33, %v4821_v11  ;;  %v1532_v26 = vmul.f32 %v4025_v46, %v4654_v30  ;;  %v1533_v59 = vmul.f32 %v4025_v46, %v4656_v56  ;;  %v4858_v44 = vld [vmem:[#allocation2 + $0x151] sm:$0xff]  ;;  %v4868_v57 = vld [vmem:[#allocation2 + $0x15a] sm:$0xff] }
 0x1a1   : > { %v2472_v35 = vmax.f32 %v2440_v0, 0.0  ;;  %v1963_v29 = vadd.f32 %v1931_v10, %v1863_v12  ;;  %v1964_v38 = vadd.f32 %v1932_v20, %v1864_v36  ;;  %v1632_v37 = vmul.f32 %v4756_v3, %v4027_v47 }
 0x1a2   : > { %v2473_v52 = vmax.f32 %v2441_v6, 0.0  ;;  %v1633_v58 = vmul.f32 %v4763_v7, %v4027_v47  ;;  %v1732_v24 = vmul.f32 %v4767_v2, %v4030_v51  ;;  %v1733_v30 = vmul.f32 %v4769_v48, %v4030_v51  ;;  %v4860_v48 = vld [vmem:[#allocation2 + $0x159] sm:$0xff] }
 0x1a3   : > { %v2063_v34 = vadd.f32 %v2031_v16, %v1963_v29  ;;  %v2064_v54 = vadd.f32 %v2032_v60, %v1964_v38  ;;  %v1833_v50 = vmul.f32 %v4046_v4, %v4716_v40  ;;  %v1664_v56 = vadd.f32 %v1632_v37, %v1532_v26  ;;  %v4866_v16 = vld [vmem:[#allocation2 + $0x152] sm:$0xff] }
 0x1a4   : > { %v2494_v55 = vpack.c.bf16 %v2473_v52, %v2472_v35  ;;  %v1665_v49 = vadd.f32 %v1633_v58, %v1533_v59  ;;  %v1834_v3 = vmul.f32 %v4046_v4, %v4736_v8  ;;  %v1933_v7 = vmul.f32 %v4806_v62, %v4055_v13 }
 0x1a5   : > { %v2164_v61 = vadd.f32 %v2132_v32, %v2063_v34  ;;  %v2165_v9 = vadd.f32 %v2133_v25, %v2064_v54  ;;  %v1934_v2 = vmul.f32 %v4814_v45, %v4055_v13  ;;  %v1764_v43 = vadd.f32 %v1732_v24, %v1664_v56 }
 0x1a6   : > { %3620 = vmatprep.mubr.bf16.mxu1 %v2494_v55  ;;  %v1765_v41 = vadd.f32 %v1733_v30, %v1665_v49  ;;  %v2033_v10 = vmul.f32 %v4819_v15, %v4061_v21  ;;  %v2034_v20 = vmul.f32 %v4821_v11, %v4061_v21  ;;  %v2134_v60 = vmul.f32 %v4065_v27, %v4784_v23 }
 0x1a7   : > { %v2264_v5 = vadd.f32 %v2232_v17, %v2164_v61  ;;  %v2265_v53 = vadd.f32 %v2233_v31, %v2165_v9  ;;  %v2135_v19 = vmul.f32 %v4065_v27, %v4786_v22  ;;  %v1865_v32 = vadd.f32 %v1833_v50, %v1764_v43 }
 0x1a8   : > { %v1866_v25 = vadd.f32 %v1834_v3, %v1765_v41  ;;  %v2234_v0 = vmul.f32 %v4067_v28, %v4858_v44  ;;  %v2235_v12 = vmul.f32 %v4067_v28, %v4860_v48  ;;  %v2334_v17 = vmul.f32 %v4071_v33, %v4866_v16 }
 0x1a9   : > { %v2364_v36 = vadd.f32 %v2332_v1, %v2264_v5  ;;  %v2365_v6 = vadd.f32 %v2333_v63, %v2265_v53  ;;  %v2335_v31 = vmul.f32 %v4071_v33, %v4868_v57  ;;  %v1965_v26 = vadd.f32 %v1933_v7, %v1865_v32  ;;  %v3709_v32 = vld [vmem:[#allocation2 + $0x168] sm:$0xff] }
 0x1aa   : > { %v1966_v35 = vadd.f32 %v1934_v2, %v1866_v25  ;;  %v1534_v29 = vmul.f32 %v4025_v46, %v4716_v40  ;;  %v1535_v38 = vmul.f32 %v4025_v46, %v4736_v8  ;;  %v1634_v1 = vmul.f32 %v4806_v62, %v4027_v47 }
 0x1ab   : > { %v2403_v59 = vmul.f32 %v4668_v39, %v2364_v36  ;;  %v2404_v52 = vmul.f32 %v4668_v39, %v2365_v6  ;;  %v1635_v63 = vmul.f32 %v4814_v45, %v4027_v47  ;;  %v2065_v37 = vadd.f32 %v2033_v10, %v1965_v26  ;;  %v2200_v36 = vld [vmem:[#allocation2 + $0x169] sm:$0xff]  ;;  %v2201_v6 = vld [vmem:[#allocation2 + $0x171] sm:$0xff] }
 0x1ac   : > { %v2066_v58 = vadd.f32 %v2034_v20, %v1966_v35  ;;  %v1734_v24 = vmul.f32 %v4819_v15, %v4030_v51  ;;  %v1735_v40 = vmul.f32 %v4821_v11, %v4030_v51  ;;  %v1666_v54 = vadd.f32 %v1634_v1, %v1534_v29  ;;  %v2300_v29 = vld [vmem:[#allocation2 + $0x16a] sm:$0xff] }
 0x1ad   : > { %v2442_v8 = vadd.f32 %v4685_v42, %v2403_v59  ;;  %v2443_v34 = vadd.f32 %v4685_v42, %v2404_v52  ;;  %v1667_v30 = vadd.f32 %v1635_v63, %v1535_v38  ;;  %v2166_v50 = vadd.f32 %v2134_v60, %v2065_v37  ;;  %v2301_v38 = vld [vmem:[#allocation2 + $0x172] sm:$0xff] }
 0x1ae   : > { %v2167_v55 = vadd.f32 %v2135_v19, %v2066_v58  ;;  %v1835_v62 = vmul.f32 %v4046_v4, %v4784_v23  ;;  %v1836_v45 = vmul.f32 %v4046_v4, %v4786_v22  ;;  %v1766_v15 = vadd.f32 %v1734_v24, %v1666_v54 }
 0x1af   : > { %v2474_v56 = vmax.f32 %v2442_v8, 0.0  ;;  %v2475_v49 = vmax.f32 %v2443_v34, 0.0  ;;  %v1767_v3 = vadd.f32 %v1735_v40, %v1667_v30  ;;  %v2266_v61 = vadd.f32 %v2234_v0, %v2166_v50  ;;  %v3710_v0 = vld [vmem:[#allocation2 + $0x170] sm:$0xff] }
 0x1b0   : > { %v2267_v11 = vadd.f32 %v2235_v12, %v2167_v55  ;;  %v1935_v9 = vmul.f32 %v4858_v44, %v4055_v13  ;;  %v1936_v7 = vmul.f32 %v4860_v48, %v4055_v13  ;;  %v1867_v43 = vadd.f32 %v1835_v62, %v1766_v15 }
 0x1b1   : > { %v2495_v2 = vpack.c.bf16 %v2475_v49, %v2474_v56  ;;  %v1868_v41 = vadd.f32 %v1836_v45, %v1767_v3  ;;  %v2366_v10 = vadd.f32 %v2334_v17, %v2266_v61  ;;  %v2035_v5 = vmul.f32 %v4866_v16, %v4061_v21 }
 0x1b2   : > { %v2367_v20 = vadd.f32 %v2335_v31, %v2267_v11  ;;  %v2036_v53 = vmul.f32 %v4868_v57, %v4061_v21  ;;  %v1967_v60 = vadd.f32 %v1935_v9, %v1867_v43  ;;  %v2136_v25 = vmul.f32 %v3709_v32, %v4065_v27 }
 0x1b3   : > { %3621 = vmatmul.mubr.bf16.gmra.mrb[40].mxu1 %v2495_v2  ;;  %v1968_v19 = vadd.f32 %v1936_v7, %v1868_v41  ;;  %v2137_v12 = vmul.f32 %v3710_v0, %v4065_v27  ;;  %v2405_v17 = vmul.f32 %v4668_v39, %v2366_v10  ;;  %v2236_v26 = vmul.f32 %v4067_v28, %v2200_v36 }
 0x1b4   : > { %v2406_v31 = vmul.f32 %v4668_v39, %v2367_v20  ;;  %v2237_v35 = vmul.f32 %v4067_v28, %v2201_v6  ;;  %v2067_v59 = vadd.f32 %v2035_v5, %v1967_v60  ;;  %v2336_v1 = vmul.f32 %v4071_v33, %v2300_v29  ;;  %v2203_v60 = vld [vmem:[#allocation2 + $0x189] sm:$0xff] }
 0x1b5   : > { %v2068_v52 = vadd.f32 %v2036_v53, %v1968_v19  ;;  %v2337_v63 = vmul.f32 %v4071_v33, %v2301_v38  ;;  %v2444_v37 = vadd.f32 %v4685_v42, %v2405_v17  ;;  %v1536_v24 = vmul.f32 %v4025_v46, %v4784_v23  ;;  %v2202_v53 = vld [vmem:[#allocation2 + $0x181] sm:$0xff] }
 0x1b6   : > { %v2445_v58 = vadd.f32 %v4685_v42, %v2406_v31  ;;  %v1636_v40 = vmul.f32 %v4858_v44, %v4027_v47  ;;  %v2168_v8 = vadd.f32 %v2136_v25, %v2067_v59  ;;  %v1537_v54 = vmul.f32 %v4025_v46, %v4786_v22  ;;  %v2302_v31 = vld [vmem:[#allocation2 + $0x182] sm:$0xff] }
 0x1b7   : > { %v2169_v34 = vadd.f32 %v2137_v12, %v2068_v52  ;;  %v1637_v30 = vmul.f32 %v4860_v48, %v4027_v47  ;;  %v2476_v50 = vmax.f32 %v2444_v37, 0.0  ;;  %v1736_v45 = vmul.f32 %v4866_v16, %v4030_v51 }
 0x1b8   : > { %v2477_v55 = vmax.f32 %v2445_v58, 0.0  ;;  %v1668_v62 = vadd.f32 %v1636_v40, %v1536_v24  ;;  %v2268_v56 = vadd.f32 %v2236_v26, %v2168_v8  ;;  %v1737_v44 = vmul.f32 %v4868_v57, %v4030_v51 }
 0x1b9   : > { %v2269_v49 = vadd.f32 %v2237_v35, %v2169_v34  ;;  %v1669_v23 = vadd.f32 %v1637_v30, %v1537_v54  ;;  %v1837_v61 = vmul.f32 %v3709_v32, %v4046_v4  ;;  %v1838_v22 = vmul.f32 %v3710_v0, %v4046_v4 }
 0x1ba   : > { %v2496_v15 = vpack.c.bf16 %v2477_v55, %v2476_v50  ;;  %v1768_v3 = vadd.f32 %v1736_v45, %v1668_v62  ;;  %v2368_v11 = vadd.f32 %v2336_v1, %v2268_v56  ;;  %v1937_v7 = vmul.f32 %v2200_v36, %v4055_v13 }
 0x1bb   : > { %v2369_v48 = vadd.f32 %v2337_v63, %v2269_v49  ;;  %v1769_v9 = vadd.f32 %v1737_v44, %v1669_v23  ;;  %v1938_v16 = vmul.f32 %v2201_v6, %v4055_v13  ;;  %v2037_v43 = vmul.f32 %v2300_v29, %v4061_v21 }
 0x1bc   : > { %3624 = vmatprep.mubr.bf16.mxu1 %v2496_v15  ;;  %v1869_v2 = vadd.f32 %v1837_v61, %v1768_v3  ;;  %v2038_v41 = vmul.f32 %v2301_v38, %v4061_v21  ;;  %v2407_v57 = vmul.f32 %v4668_v39, %v2368_v11  ;;  %v2138_v5 = vmul.f32 %v4065_v27, %v4563_v18  ;;  %v3711_v11 = vld [vmem:[#allocation2] sm:$0xff] }
 0x1bd   : > { %v2408_v10 = vmul.f32 %v4668_v39, %v2369_v48  ;;  %v1870_v20 = vadd.f32 %v1838_v22, %v1769_v9  ;;  %v2139_v25 = vmul.f32 %v4065_v27, %v4565_v14  ;;  %v2238_v12 = vmul.f32 %v4067_v28, %v2202_v53  ;;  %v2204_v22 = vld [vmem:[#allocation2 + $0x199] sm:$0xff]  ;;  %v2205_v9 = vld [vmem:[#allocation2 + $0x1a1] sm:$0xff] }
 0x1be   : > { %v1969_v19 = vadd.f32 %v1937_v7, %v1869_v2  ;;  %v2239_v17 = vmul.f32 %v4067_v28, %v2203_v60  ;;  %v2446_v26 = vadd.f32 %v4685_v42, %v2407_v57  ;;  %v2338_v52 = vmul.f32 %v4071_v33, %v2302_v31  ;;  %v2305_v57 = vld [vmem:[#allocation2 + $0x1a2] sm:$0xff] }
 0x1bf   : > { %v2447_v35 = vadd.f32 %v4685_v42, %v2408_v10  ;;  %v1970_v59 = vadd.f32 %v1938_v16, %v1870_v20  ;;  %v1538_v63 = vmul.f32 %v3709_v32, %v4025_v46  ;;  %v1539_v37 = vmul.f32 %v3710_v0, %v4025_v46  ;;  %v2303_v0 = vld [vmem:[#allocation2 + $0x18a] sm:$0xff] }
 0x1c0   : > { %v2069_v1 = vadd.f32 %v2037_v43, %v1969_v19  ;;  %v1638_v58 = vmul.f32 %v2200_v36, %v4027_v47  ;;  %v2478_v24 = vmax.f32 %v2446_v26, 0.0  ;;  %v1639_v34 = vmul.f32 %v2201_v6, %v4027_v47 }
 0x1c1   : > { %v2479_v40 = vmax.f32 %v2447_v35, 0.0  ;;  %v2070_v8 = vadd.f32 %v2038_v41, %v1970_v59  ;;  %v1738_v50 = vmul.f32 %v2300_v29, %v4030_v51  ;;  %v1739_v55 = vmul.f32 %v2301_v38, %v4030_v51 }
 0x1c2   : > { %v2170_v54 = vadd.f32 %v2138_v5, %v2069_v1  ;;  %v1670_v30 = vadd.f32 %v1638_v58, %v1538_v63  ;;  %v1671_v56 = vadd.f32 %v1639_v34, %v1539_v37  ;;  %v1839_v32 = vmul.f32 %v4046_v4, %v4563_v18  ;;  %v3352_v63 = vld [vmem:[%s3848_s17 + $0x19] sm:$0xff]  ;;  %v3356_v34 = vld [vmem:[%s3848_s17 + $0x49] sm:$0xff] }
 0x1c3   : > { %v2497_v62 = vpack.c.bf16 %v2479_v40, %v2478_v24  ;;  %v2171_v45 = vadd.f32 %v2139_v25, %v2070_v8  ;;  %v1840_v49 = vmul.f32 %v4046_v4, %v4565_v14  ;;  %v1939_v47 = vmul.f32 %v2202_v53, %v4055_v13  ;;  %v3354_v8 = vld [vmem:[%s3848_s17 + $0x31] sm:$0xff] }
 0x1c4   : > { %v2270_v46 = vadd.f32 %v2238_v12, %v2170_v54  ;;  %v1770_v36 = vadd.f32 %v1738_v50, %v1670_v30  ;;  %v2339_v29 = vmul.f32 %v4071_v33, %v2303_v0  ;;  %v1771_v23 = vadd.f32 %v1739_v55, %v1671_v56  ;;  %v3358_v50 = vld [vmem:[%s3848_s17 + $0x61] sm:$0xff]  ;;  %v3359_v55 = vld [vmem:[%s3848_s17 + $0x69] sm:$0xff] }
 0x1c5   : > { %3625 = vmatmul.mubr.bf16.gmra.mrb[44].mxu1 %v2497_v62  ;;  %v2271_v6 = vadd.f32 %v2239_v17, %v2171_v45  ;;  %v1940_v51 = vmul.f32 %v2203_v60, %v4055_v13  ;;  %v2039_v15 = vmul.f32 %v2302_v31, %v4061_v21  ;;  %v2040_v61 = vmul.f32 %v2303_v0, %v4061_v21  ;;  %v2304_v13 = vld [vmem:[#allocation2 + $0x19a] sm:$0xff] }
 0x1c6   : > { %v2370_v38 = vadd.f32 %v2338_v52, %v2270_v46  ;;  %v1871_v44 = vadd.f32 %v1839_v32, %v1770_v36  ;;  %v1872_v3 = vadd.f32 %v1840_v49, %v1771_v23  ;;  %v2140_v48 = vmul.f32 %v3711_v11, %v4065_v27  ;;  %v3360_v62 = vld [vmem:[%s3848_s17 + $0x79] sm:$0xff]  ;;  %v3361_v45 = vld [vmem:[%s3848_s17 + $0x81] sm:$0xff]  ;;  %v3362_v46 = vld [vmem:[%s3848_s17 + $0x91] sm:$0xff] }
 0x1c7   : > { %v2371_v18 = vadd.f32 %v2339_v29, %v2271_v6  ;;  %v2240_v41 = vmul.f32 %v4067_v28, %v2204_v22  ;;  %v2241_v20 = vmul.f32 %v4067_v28, %v2205_v9  ;;  %v2340_v27 = vmul.f32 %v4071_v33, %v2304_v13  ;;  %v3363_v0 = vld [vmem:[%s3848_s17 + $0x99] sm:$0xff]  ;;  %v3364_v36 = vld [vmem:[%s3848_s17 + $0xa9] sm:$0xff]  ;;  %v3365_v49 = vld [vmem:[%s3848_s17 + $0xb1] sm:$0xff] }
 0x1c8   : > { %v2409_v4 = vmul.f32 %v4668_v39, %v2370_v38  ;;  %v1971_v14 = vadd.f32 %v1939_v47, %v1871_v44  ;;  %v1972_v2 = vadd.f32 %v1940_v51, %v1872_v3  ;;  %v2341_v25 = vmul.f32 %v4071_v33, %v2305_v57  ;;  %v3353_v33 = vld [vmem:[%s3848_s17 + $0x21] sm:$0xff]  ;;  %v3367_v23 = vld [vmem:[%s3848_s17 + $0xc9] sm:$0xff]  ;;  %v3368_v51 = vld [vmem:[%s3848_s17 + $0xd9] sm:$0xff] }
 0x1c9   : > { %v2410_v7 = vmul.f32 %v4668_v39, %v2371_v18  ;;  %v2838_v24 = vpack.c.bf16 %v3353_v33, %v3352_v63  ;;  %v2841_v56 = vpack.c.bf16 %v3359_v55, %v3358_v50  ;;  %v2842_v32 = vpack.c.bf16 %v3361_v45, %v3360_v62  ;;  %v3366_v29 = vld [vmem:[%s3848_s17 + $0xc1] sm:$0xff]  ;;  %v3370_v18 = vld [vmem:[%s3848_s17 + $0xf1] sm:$0xff]  ;;  %v3371_v3 = vld [vmem:[%s3848_s17 + $0xf9] sm:$0xff] }
 0x1ca   : > { %v2448_v16 = vadd.f32 %v4685_v42, %v2409_v4  ;;  %v2071_v43 = vadd.f32 %v2039_v15, %v1971_v14  ;;  %v2072_v10 = vadd.f32 %v2040_v61, %v1972_v2  ;;  %v2843_v47 = vpack.c.bf16 %v3363_v0, %v3362_v46  ;;  %v3369_v38 = vld [vmem:[%s3848_s17 + $0xe1] sm:$0xff]  ;;  %v3372_v61 = vld [vmem:[%s3848_s17 + $0x109] sm:$0xff]  ;;  %v3373_v22 = vld [vmem:[%s3848_s17 + $0x111] sm:$0xff] }
 0x1cb   : > { %v2449_v21 = vadd.f32 %v4685_v42, %v2410_v7  ;;  %v2844_v6 = vpack.c.bf16 %v3365_v49, %v3364_v36  ;;  %v2845_v44 = vpack.c.bf16 %v3367_v23, %v3366_v29  ;;  %v2846_v15 = vpack.c.bf16 %v3369_v38, %v3368_v51  ;;  %v3374_v11 = vld [vmem:[%s3848_s17 + $0x121] sm:$0xff]  ;;  %v3376_v7 = vld [vmem:[%s3848_s17 + $0x139] sm:$0xff] }
 0x1cc   : > { %v2480_v5 = vmax.f32 %v2448_v16, 0.0  ;;  %v2172_v53 = vadd.f32 %v2140_v48, %v2071_v43  ;;  %v2173_v19 = vadd.f32 %v2140_v48, %v2072_v10  ;;  %v2847_v4 = vpack.c.bf16 %v3371_v3, %v3370_v18  ;;  %v3375_v48 = vld [vmem:[%s3848_s17 + $0x129] sm:$0xff]  ;;  %v3377_v2 = vld [vmem:[%s3848_s17 + $0x141] sm:$0xff]  ;;  %v3379_v10 = vld [vmem:[%s3848_s17 + $0x159] sm:$0xff] }
 0x1cd   : > { %v2481_v60 = vmax.f32 %v2449_v21, 0.0  ;;  %v2848_v14 = vpack.c.bf16 %v3373_v22, %v3372_v61  ;;  %v2849_v43 = vpack.c.bf16 %v3375_v48, %v3374_v11  ;;  %v2850_v57 = vpack.c.bf16 %v3377_v2, %v3376_v7  ;;  %v3378_v21 = vld [vmem:[%s3848_s17 + $0x151] sm:$0xff]  ;;  %v5078_v0 = vld [vmem:[%s5335_s8] ss:$0 sm:$0xff] }
 0x1ce   : > { %v2272_v12 = vadd.f32 %v2240_v41, %v2172_v53  ;;  %v2273_v31 = vadd.f32 %v2241_v20, %v2173_v19  ;;  %v3380_v20 = vld [vmem:[%s3848_s17 + $0x169] sm:$0xff]  ;;  %v2851_v53 = vpack.c.bf16 %v3379_v10, %v3378_v21  ;;  %v5083_v36 = vld [vmem:[%s5338_s11] ss:$0 sm:$0xff] }
 0x1cf   : > { %v2498_v17 = vpack.c.bf16 %v2481_v60, %v2480_v5  ;;  %v3381_v5 = vld [vmem:[%s3848_s17 + $0x171] sm:$0xff]  ;;  %v3382_v60 = vld [vmem:[%s3848_s17 + $0x181] sm:$0xff]  ;;  %v3383_v19 = vld [vmem:[%s3848_s17 + $0x189] sm:$0xff] }
 0x1d0   : > { %v2372_v26 = vadd.f32 %v2340_v27, %v2272_v12  ;;  %v2373_v35 = vadd.f32 %v2341_v25, %v2273_v31  ;;  %v2852_v27 = vpack.c.bf16 %v3381_v5, %v3380_v20  ;;  %v2853_v25 = vpack.c.bf16 %v3383_v19, %v3382_v60  ;;  %v5095_v23 = vld [vmem:[%s5339_s12] ss:$0 sm:$0xff] }
 0x1d1   : > { %3628 = vmatprep.mubr.bf16.mxu1 %v2498_v17 }
 0x1d2   : > { %v2411_v28 = vmul.f32 %v4668_v39, %v2372_v26  ;;  %v2412_v59 = vmul.f32 %v4668_v39, %v2373_v35  ;;  %v3355_v39 = vld [vmem:[%s3848_s17 + $0x39] sm:$0xff] }
 0x1d3   : > { %v2839_v54 = vpack.c.bf16 %v3355_v39, %v3354_v8 }
 0x1d4   : > { %v2450_v52 = vadd.f32 %v4685_v42, %v2411_v28  ;;  %v2451_v1 = vadd.f32 %v4685_v42, %v2412_v59  ;;  %v3357_v42 = vld [vmem:[%s3848_s17 + $0x51] sm:$0xff] }
 0x1d5   : > { %v2840_v30 = vpack.c.bf16 %v3357_v42, %v3356_v34 }
 0x1d6   : > { %v2482_v37 = vmax.f32 %v2450_v52, 0.0  ;;  %v2483_v58 = vmax.f32 %v2451_v1, 0.0 }
 0x1d8   : > { %v2499_v40 = vpack.c.bf16 %v2483_v58, %v2482_v37 }
 0x1da   : > { %3629 = vmatmul.mubr.bf16.gmra.mrb[48].mxu1 %v2499_v40 }
 0x1db   : > { %3634 = vmatprep.mubr.msk.bf16.mxu1 %vm552_vm2, %v2838_v24 }
 0x1e2   : > { %3635 = vmatmul.mubr.msk.bf16.vlgmr.msra.gmra.mrb[52].mxu1 %vm552_vm2, %v2839_v54 }
 0x1e3   : > { %3638 = vmatprep.mubr.msk.bf16.mxu1 %vm552_vm2, %v2840_v30 }
 0x1ea   : > { %3639 = vmatmul.mubr.msk.bf16.gmra.mrb[56].mxu1 %vm552_vm2, %v2841_v56 }
 0x1eb   : > { %3642 = vmatprep.mubr.msk.bf16.mxu1 %vm552_vm2, %v2842_v32 }
 0x1f2   : > { %3643 = vmatmul.mubr.msk.bf16.gmra.mrb[60].mxu1 %vm552_vm2, %v2843_v47  ;;  %v5089_v47 = vld [vmem:[%s5336_s9] ss:$0 sm:$0xff] }
 0x1f3   : > { %3646 = vmatprep.mubr.msk.bf16.mxu1 %vm552_vm2, %v2844_v6 }
 0x1fa   : > { %3647 = vmatmul.mubr.msk.bf16.gmra.mrb[64].mxu1 %vm552_vm2, %v2845_v44 }
 0x1fb   : > { %3650 = vmatprep.mubr.msk.bf16.mxu1 %vm552_vm2, %v2846_v15 }
 0x202   : > { %3651 = vmatmul.mubr.msk.bf16.gmra.mrb[68].mxu1 %vm552_vm2, %v2847_v4 }
 0x203   : > { %3654 = vmatprep.mubr.msk.bf16.mxu1 %vm552_vm2, %v2848_v14  ;;  %v3602_v9 = vpop.f32.mrb[20].mxu1 }
 0x204   : > { %v2598_v13 = vpop.f32.mrb[21].mxu1  ;;  %v2734_v49 = vmul.f32 %v3602_v9, %v5078_v0 }
 0x205   : > { %v3603_v16 = vpop.f32.mrb[22].mxu1  ;;  %v2732_v6 = vmul.f32 %v5078_v0, %v2598_v13 }
 0x206   : > { %v2601_v41 = vpop.f32.mrb[23].mxu1  ;;  %v2735_v51 = vmul.f32 %v3603_v16, %v5078_v0  ;;  %v2773_v61 = vadd.f32 %v5089_v47, %v2734_v49 }
 0x207   : > { %v2733_v15 = vmul.f32 %v5078_v0, %v2601_v41  ;;  %v2771_v11 = vadd.f32 %v5089_v47, %v2732_v6 }
 0x208   : > { %v2774_v7 = vadd.f32 %v5089_v47, %v2735_v51 }
 0x209   : > { %v2772_v16 = vadd.f32 %v5089_v47, %v2733_v15 }
 0x20a   : > { %3655 = vmatmul.mubr.msk.bf16.gmra.mrb[72].mxu1 %vm552_vm2, %v2849_v43 }
 0x20b   : > { %3658 = vmatprep.mubr.msk.bf16.mxu1 %vm552_vm2, %v2850_v57 }
 0x212   : > { %3659 = vmatmul.mubr.msk.bf16.gmra.mrb[76].mxu1 %vm552_vm2, %v2851_v53 }
 0x213   : > { %3662 = vmatprep.mubr.msk.bf16.mxu1 %vm552_vm2, %v2852_v27 }
 0x21a   : > { %3663 = vmatmul.mubr.msk.bf16.gmra.mrb[80].mxu1 %vm552_vm2, %v2853_v25 }
 0x21b   : > { %v3606_v12 = vpop.f32.mrb[24].mxu1 }
 0x21c   : > { %v2614_v17 = vpop.f32.mrb[25].mxu1  ;;  %v2738_v57 = vmul.f32 %v3606_v12, %v5078_v0 }
 0x21d   : > { %v3607_v31 = vpop.f32.mrb[26].mxu1  ;;  %v2736_v10 = vmul.f32 %v5078_v0, %v2614_v17 }
 0x21e   : > { %v5025_v26 = vpop.f32.mrb[27].mxu1  ;;  %v2739_v53 = vmul.f32 %v3607_v31, %v5078_v0  ;;  %v2777_v17 = vadd.f32 %v5089_v47, %v2738_v57 }
 0x21f   : > { %v2737_v19 = vmul.f32 %v5078_v0, %v5025_v26 }
 0x233   : > { %v5027_v35 = vpop.f32.mrb[28].mxu1 }
 0x234   : > { %v5029_v28 = vpop.f32.mrb[29].mxu1 }
 0x235   : > { %v5031_v59 = vpop.f32.mrb[30].mxu1 }
 0x236   : > { %v5033_v52 = vpop.f32.mrb[31].mxu1 }
 0x24d   : > { %v5035_v1 = vpop.f32.mrb[32].mxu1 }
 0x24e   : > { %v5037_v63 = vpop.f32.mrb[33].mxu1 }
 0x24f   : > { %v5039_v33 = vpop.f32.mrb[34].mxu1 }
 0x250   : > { %v5041_v37 = vpop.f32.mrb[35].mxu1 }
 0x26b   : > { %v5043_v58 = vpop.f32.mrb[36].mxu1 }
 0x26c   : > { %v5045_v24 = vpop.f32.mrb[37].mxu1 }
 0x26d   : > { %v5047_v40 = vpop.f32.mrb[38].mxu1 }
 0x26e   : > { %v5049_v8 = vpop.f32.mrb[39].mxu1 }
 0x286   : > { %v5051_v39 = vpop.f32.mrb[40].mxu1 }
 0x287   : > { %v5053_v34 = vpop.f32.mrb[41].mxu1 }
 0x288   : > { %v5055_v42 = vpop.f32.mrb[42].mxu1 }
 0x289   : > { %v5057_v54 = vpop.f32.mrb[43].mxu1 }
 0x298   : > { %v5059_v30 = vpop.f32.mrb[44].mxu1 }
 0x299   : > { %v5061_v50 = vpop.f32.mrb[45].mxu1 }
 0x29a   : > { %v5063_v55 = vpop.f32.mrb[46].mxu1 }
 0x29b   : > { %v5065_v62 = vpop.f32.mrb[47].mxu1 }
 0x2ad   : > { %v5067_v45 = vpop.f32.mrb[48].mxu1 }
 0x2ae   : > { %v5069_v56 = vpop.f32.mrb[49].mxu1 }
 0x2af   : > { %v5071_v32 = vpop.f32.mrb[50].mxu1 }
 0x2b0   : > { %v5073_v46 = vpop.f32.mrb[51].mxu1 }
 0x2b5   : > { %v3636_v29 = vpop.f32.mrb[52].mxu1 }
 0x2b6   : > { %v3076_v38 = vmul.f32 %v3636_v29, %v5083_v36  ;;  %v2940_v44 = vpop.f32.mrb[53].mxu1  ;;  %v2775_v29 = vadd.f32 %v5089_v47, %v2736_v10 }
 0x2b7   : > { %v3074_v18 = vmul.f32 %v5083_v36, %v2940_v44  ;;  %v3637_v3 = vpop.f32.mrb[54].mxu1 }
 0x2b8   : > { %v3115_v22 = vadd.f32 %v5095_v23, %v3076_v38  ;;  %v3077_v4 = vmul.f32 %v3637_v3, %v5083_v36  ;;  %v2943_v14 = vpop.f32.mrb[55].mxu1  ;;  %v2778_v38 = vadd.f32 %v5089_v47, %v2739_v53 }
 0x2b9   : > { %v3113_v48 = vadd.f32 %v5095_v23, %v3074_v18  ;;  %v3075_v9 = vmul.f32 %v5083_v36, %v2943_v14  ;;  %v2776_v18 = vadd.f32 %v5089_v47, %v2737_v19  ;;  %v2740_v14 = vmul.f32 %v5078_v0, %v5029_v28 }
 0x2ba   : > { %v3147_v2 = vadd.f32 %v3115_v22, %v2773_v61  ;;  %v3116_v13 = vadd.f32 %v5095_v23, %v3077_v4  ;;  %v2742_v22 = vmul.f32 %v5027_v35, %v5078_v0  ;;  %v2741_v35 = vmul.f32 %v5078_v0, %v5033_v52 }
 0x2bb   : > { %v3145_v43 = vadd.f32 %v3113_v48, %v2771_v11  ;;  %v3114_v41 = vadd.f32 %v5095_v23, %v3075_v9  ;;  %v2743_v9 = vmul.f32 %v5031_v59, %v5078_v0  ;;  %v2779_v57 = vadd.f32 %v5089_v47, %v2740_v14 }
 0x2bc   : > { %3180 = vst.msk [vmem:[%s5109_s25 + $0x10] sm:$0xff] %vm3177_vm5, %v3147_v2  ;;  %v3148_v21 = vadd.f32 %v3116_v13, %v2774_v7  ;;  %v2780_v53 = vadd.f32 %v5089_v47, %v2741_v35  ;;  %v2746_v19 = vmul.f32 %v5035_v1, %v5078_v0  ;;  %v2745_v1 = vmul.f32 %v5078_v0, %v5041_v37 }
 0x2bd   : > { %3178 = vst.msk [vmem:[%s5109_s25] sm:$0xff] %vm3177_vm5, %v3145_v43  ;;  %v3146_v20 = vadd.f32 %v3114_v41, %v2772_v16  ;;  %v3640_v5 = vpop.f32.mrb[56].mxu1  ;;  %v2781_v16 = vadd.f32 %v5089_v47, %v2742_v22  ;;  %v2782_v10 = vadd.f32 %v5089_v47, %v2743_v9 }
 0x2be   : > { %3181 = vst.msk [vmem:[%s5109_s25 + $0x18] sm:$0xff] %vm3177_vm5, %v3148_v21  ;;  %v3080_v27 = vmul.f32 %v3640_v5, %v5083_v36  ;;  %v2956_v60 = vpop.f32.mrb[57].mxu1 }
 0x2bf   : > { %3179 = vst.msk [vmem:[%s5109_s25 + $0x8] sm:$0xff] %vm3177_vm5, %v3146_v20  ;;  %v3078_v25 = vmul.f32 %v5083_v36, %v2956_v60  ;;  %v3641_v12 = vpop.f32.mrb[58].mxu1 }
 0x2c0   : > { %v3119_v49 = vadd.f32 %v5095_v23, %v3080_v27  ;;  %v3081_v31 = vmul.f32 %v3641_v12, %v5083_v36  ;;  %v2959_v6 = vpop.f32.mrb[59].mxu1  ;;  %v2744_v12 = vmul.f32 %v5078_v0, %v5037_v63 }
 0x2c1   : > { %v3117_v51 = vadd.f32 %v5095_v23, %v3078_v25  ;;  %v3079_v26 = vmul.f32 %v5083_v36, %v2959_v6 }
 0x2c2   : > { %v3151_v44 = vadd.f32 %v3119_v49, %v2777_v17  ;;  %v3120_v15 = vadd.f32 %v5095_v23, %v3081_v31  ;;  %v2747_v31 = vmul.f32 %v5039_v33, %v5078_v0 }
 0x2c3   : > { %v3149_v3 = vadd.f32 %v3117_v51, %v2775_v29  ;;  %v3118_v61 = vadd.f32 %v5095_v23, %v3079_v26  ;;  %v2785_v26 = vadd.f32 %v5089_v47, %v2746_v19  ;;  %v2754_v19 = vmul.f32 %v5051_v39, %v5078_v0 }
 0x2c4   : > { %3184 = vst.msk [vmem:[%s5109_s25 + $0x30] sm:$0xff] %vm3177_vm5, %v3151_v44  ;;  %v3152_v4 = vadd.f32 %v3120_v15, %v2778_v38  ;;  %v2783_v15 = vadd.f32 %v5089_v47, %v2744_v12  ;;  %v2752_v12 = vmul.f32 %v5078_v0, %v5053_v34  ;;  %v2753_v39 = vmul.f32 %v5078_v0, %v5057_v54 }
 0x2c5   : > { %3182 = vst.msk [vmem:[%s5109_s25 + $0x20] sm:$0xff] %vm3177_vm5, %v3149_v3  ;;  %v3150_v11 = vadd.f32 %v3118_v61, %v2776_v18  ;;  %v3644_v48 = vpop.f32.mrb[60].mxu1  ;;  %v2786_v3 = vadd.f32 %v5089_v47, %v2747_v31  ;;  %v2755_v31 = vmul.f32 %v5055_v42, %v5078_v0 }
 0x2c6   : > { %3185 = vst.msk [vmem:[%s5109_s25 + $0x38] sm:$0xff] %vm3177_vm5, %v3152_v4  ;;  %v3084_v7 = vmul.f32 %v3644_v48, %v5083_v36  ;;  %v2972_v2 = vpop.f32.mrb[61].mxu1  ;;  %v2784_v4 = vadd.f32 %v5089_v47, %v2745_v1  ;;  %v2750_v48 = vmul.f32 %v5043_v58, %v5078_v0  ;;  %v2749_v58 = vmul.f32 %v5078_v0, %v5049_v8 }
 0x2c7   : > { %3183 = vst.msk [vmem:[%s5109_s25 + $0x28] sm:$0xff] %vm3177_vm5, %v3150_v11  ;;  %v3082_v13 = vmul.f32 %v5083_v36, %v2972_v2  ;;  %v3645_v28 = vpop.f32.mrb[62].mxu1 }
 0x2c8   : > { %v3123_v43 = vadd.f32 %v5095_v23, %v3084_v7  ;;  %v3085_v59 = vmul.f32 %v3645_v28, %v5083_v36  ;;  %v2975_v41 = vpop.f32.mrb[63].mxu1  ;;  %v2748_v7 = vmul.f32 %v5078_v0, %v5045_v24 }
 0x2c9   : > { %v3121_v21 = vadd.f32 %v5095_v23, %v3082_v13  ;;  %v3083_v52 = vmul.f32 %v5083_v36, %v2975_v41  ;;  %v2751_v13 = vmul.f32 %v5047_v40, %v5078_v0 }
 0x2ca   : > { %v3155_v20 = vadd.f32 %v3123_v43, %v2781_v16  ;;  %v3124_v5 = vadd.f32 %v5095_v23, %v3085_v59  ;;  %v2789_v59 = vadd.f32 %v5089_v47, %v2750_v48 }
 0x2cb   : > { %v3153_v27 = vadd.f32 %v3121_v21, %v2779_v57  ;;  %v3122_v60 = vadd.f32 %v5095_v23, %v3083_v52  ;;  %v2787_v21 = vadd.f32 %v5089_v47, %v2748_v7 }
 0x2cc   : > { %3188 = vst.msk [vmem:[%s5109_s25 + $0x50] sm:$0xff] %vm3177_vm5, %v3155_v20  ;;  %v3156_v25 = vadd.f32 %v3124_v5, %v2782_v10  ;;  %v2790_v10 = vadd.f32 %v5089_v47, %v2751_v13 }
 0x2cd   : > { %3186 = vst.msk [vmem:[%s5109_s25 + $0x40] sm:$0xff] %vm3177_vm5, %v3153_v27  ;;  %v3154_v17 = vadd.f32 %v3122_v60, %v2780_v53  ;;  %v3648_v49 = vpop.f32.mrb[64].mxu1  ;;  %v2788_v53 = vadd.f32 %v5089_v47, %v2749_v58 }
 0x2ce   : > { %3189 = vst.msk [vmem:[%s5109_s25 + $0x58] sm:$0xff] %vm3177_vm5, %v3156_v25  ;;  %v3088_v6 = vmul.f32 %v3648_v49, %v5083_v36  ;;  %v2988_v29 = vpop.f32.mrb[65].mxu1 }
 0x2cf   : > { %3187 = vst.msk [vmem:[%s5109_s25 + $0x48] sm:$0xff] %vm3177_vm5, %v3154_v17  ;;  %v3086_v51 = vmul.f32 %v5083_v36, %v2988_v29  ;;  %v3649_v63 = vpop.f32.mrb[66].mxu1 }
 0x2d0   : > { %v3127_v38 = vadd.f32 %v5095_v23, %v3088_v6  ;;  %v3089_v33 = vmul.f32 %v3649_v63, %v5083_v36  ;;  %v2991_v44 = vpop.f32.mrb[67].mxu1 }
 0x2d1   : > { %v3125_v18 = vadd.f32 %v5095_v23, %v3086_v51  ;;  %v3087_v37 = vmul.f32 %v5083_v36, %v2991_v44  ;;  %v2793_v51 = vadd.f32 %v5089_v47, %v2754_v19  ;;  %v2794_v44 = vadd.f32 %v5089_v47, %v2755_v31 }
 0x2d2   : > { %v3159_v61 = vadd.f32 %v3127_v38, %v2785_v26  ;;  %v3128_v22 = vadd.f32 %v5095_v23, %v3089_v33  ;;  %v2791_v38 = vadd.f32 %v5089_v47, %v2752_v12 }
 0x2d3   : > { %v3157_v14 = vadd.f32 %v3125_v18, %v2783_v15  ;;  %v3126_v11 = vadd.f32 %v5095_v23, %v3087_v37  ;;  %v2792_v37 = vadd.f32 %v5089_v47, %v2753_v39 }
 0x2d4   : > { %3192 = vst.msk [vmem:[%s5109_s25 + $0x70] sm:$0xff] %vm3177_vm5, %v3159_v61  ;;  %v3160_v9 = vadd.f32 %v3128_v22, %v2786_v3  ;;  %v2758_v22 = vmul.f32 %v5059_v30, %v5078_v0  ;;  %v2757_v30 = vmul.f32 %v5078_v0, %v5065_v62 }
 0x2d5   : > { %3190 = vst.msk [vmem:[%s5109_s25 + $0x60] sm:$0xff] %vm3177_vm5, %v3157_v14  ;;  %v3158_v2 = vadd.f32 %v3126_v11, %v2784_v4  ;;  %v3652_v35 = vpop.f32.mrb[68].mxu1  ;;  %v2756_v14 = vmul.f32 %v5078_v0, %v5061_v50 }
 0x2d6   : > { %3193 = vst.msk [vmem:[%s5109_s25 + $0x78] sm:$0xff] %vm3177_vm5, %v3160_v9  ;;  %v3092_v28 = vmul.f32 %v3652_v35, %v5083_v36  ;;  %v3004_v16 = vpop.f32.mrb[69].mxu1  ;;  %v2759_v9 = vmul.f32 %v5063_v55, %v5078_v0  ;;  %v2797_v13 = vadd.f32 %v5089_v47, %v2758_v22 }
 0x2d7   : > { %3191 = vst.msk [vmem:[%s5109_s25 + $0x68] sm:$0xff] %vm3177_vm5, %v3158_v2  ;;  %v3090_v43 = vmul.f32 %v5083_v36, %v3004_v16  ;;  %v3653_v24 = vpop.f32.mrb[70].mxu1  ;;  %v2795_v58 = vadd.f32 %v5089_v47, %v2756_v14 }
 0x2d8   : > { %v3131_v41 = vadd.f32 %v5095_v23, %v3092_v28  ;;  %v3093_v40 = vmul.f32 %v3653_v24, %v5083_v36  ;;  %v3007_v57 = vpop.f32.mrb[71].mxu1  ;;  %v2798_v24 = vadd.f32 %v5089_v47, %v2759_v9 }
 0x2d9   : > { %v3129_v52 = vadd.f32 %v5095_v23, %v3090_v43  ;;  %v3091_v8 = vmul.f32 %v5083_v36, %v3007_v57 }
 0x2da   : > { %v3163_v20 = vadd.f32 %v3131_v41, %v2789_v59  ;;  %v3132_v5 = vadd.f32 %v5095_v23, %v3093_v40  ;;  %v2796_v40 = vadd.f32 %v5089_v47, %v2757_v30 }
 0x2db   : > { %v3161_v27 = vadd.f32 %v3129_v52, %v2787_v21  ;;  %v3130_v60 = vadd.f32 %v5095_v23, %v3091_v8  ;;  %v2762_v52 = vmul.f32 %v5067_v45, %v5078_v0  ;;  %v2761_v45 = vmul.f32 %v5078_v0, %v5073_v46 }
 0x2dc   : > { %3196 = vst.msk [vmem:[%s5109_s25 + $0x90] sm:$0xff] %vm3177_vm5, %v3163_v20  ;;  %v3164_v25 = vadd.f32 %v3132_v5, %v2790_v10  ;;  %v2760_v10 = vmul.f32 %v5078_v0, %v5069_v56 }
 0x2dd   : > { %3194 = vst.msk [vmem:[%s5109_s25 + $0x80] sm:$0xff] %vm3177_vm5, %v3161_v27  ;;  %v3162_v17 = vadd.f32 %v3130_v60, %v2788_v53  ;;  %v3656_v49 = vpop.f32.mrb[72].mxu1  ;;  %v2763_v53 = vmul.f32 %v5071_v32, %v5078_v0  ;;  %v2800_v39 = vadd.f32 %v5089_v47, %v2761_v45 }
 0x2de   : > { %3197 = vst.msk [vmem:[%s5109_s25 + $0x98] sm:$0xff] %vm3177_vm5, %v3164_v25  ;;  %v3096_v6 = vmul.f32 %v3656_v49, %v5083_v36  ;;  %v3020_v29 = vpop.f32.mrb[73].mxu1  ;;  %v2801_v25 = vadd.f32 %v5089_v47, %v2762_v52  ;;  %v2799_v49 = vadd.f32 %v5089_v47, %v2760_v10 }
 0x2df   : > { %3195 = vst.msk [vmem:[%s5109_s25 + $0x88] sm:$0xff] %vm3177_vm5, %v3162_v17  ;;  %v3094_v1 = vmul.f32 %v5083_v36, %v3020_v29  ;;  %v3657_v34 = vpop.f32.mrb[74].mxu1  ;;  %v2802_v31 = vadd.f32 %v5089_v47, %v2763_v53 }
 0x2e0   : > { %v3135_v63 = vadd.f32 %v5095_v23, %v3096_v6  ;;  %v3097_v42 = vmul.f32 %v3657_v34, %v5083_v36  ;;  %v3023_v26 = vpop.f32.mrb[75].mxu1 }
 0x2e1   : > { %v3133_v33 = vadd.f32 %v5095_v23, %v3094_v1  ;;  %v3095_v54 = vmul.f32 %v5083_v36, %v3023_v26 }
 0x2e2   : > { %v3167_v15 = vadd.f32 %v3135_v63, %v2793_v51  ;;  %v3136_v18 = vadd.f32 %v5095_v23, %v3097_v42 }
 0x2e3   : > { %v3165_v3 = vadd.f32 %v3133_v33, %v2791_v38  ;;  %v3134_v61 = vadd.f32 %v5095_v23, %v3095_v54 }
 0x2e4   : > { %3200 = vst.msk [vmem:[%s5109_s25 + $0xb0] sm:$0xff] %vm3177_vm5, %v3167_v15  ;;  %v3168_v4 = vadd.f32 %v3136_v18, %v2794_v44 }
 0x2e5   : > { %3198 = vst.msk [vmem:[%s5109_s25 + $0xa0] sm:$0xff] %vm3177_vm5, %v3165_v3  ;;  %v3166_v11 = vadd.f32 %v3134_v61, %v2792_v37  ;;  %v3660_v48 = vpop.f32.mrb[76].mxu1 }
 0x2e6   : > { %3201 = vst.msk [vmem:[%s5109_s25 + $0xb8] sm:$0xff] %vm3177_vm5, %v3168_v4  ;;  %v3100_v7 = vmul.f32 %v3660_v48, %v5083_v36  ;;  %v3036_v2 = vpop.f32.mrb[77].mxu1 }
 0x2e7   : > { %3199 = vst.msk [vmem:[%s5109_s25 + $0xa8] sm:$0xff] %vm3177_vm5, %v3166_v11  ;;  %v3098_v35 = vmul.f32 %v5083_v36, %v3036_v2  ;;  %v3661_v50 = vpop.f32.mrb[78].mxu1 }
 0x2e8   : > { %v3139_v28 = vadd.f32 %v5095_v23, %v3100_v7  ;;  %v3101_v55 = vmul.f32 %v3661_v50, %v5083_v36  ;;  %v3039_v16 = vpop.f32.mrb[79].mxu1 }
 0x2e9   : > { %v3137_v43 = vadd.f32 %v5095_v23, %v3098_v35  ;;  %v3099_v62 = vmul.f32 %v5083_v36, %v3039_v16 }
 0x2ea   : > { %v3171_v59 = vadd.f32 %v3139_v28, %v2797_v13  ;;  %v3140_v41 = vadd.f32 %v5095_v23, %v3101_v55 }
 0x2eb   : > { %v3169_v57 = vadd.f32 %v3137_v43, %v2795_v58  ;;  %v3138_v21 = vadd.f32 %v5095_v23, %v3099_v62 }
 0x2ec   : > { %3204 = vst.msk [vmem:[%s5109_s25 + $0xd0] sm:$0xff] %vm3177_vm5, %v3171_v59  ;;  %v3172_v8 = vadd.f32 %v3140_v41, %v2798_v24 }
 0x2ed   : > { %3202 = vst.msk [vmem:[%s5109_s25 + $0xc0] sm:$0xff] %vm3177_vm5, %v3169_v57  ;;  %v3170_v20 = vadd.f32 %v3138_v21, %v2796_v40  ;;  %v3664_v5 = vpop.f32.mrb[80].mxu1 }
 0x2ee   : > { %3205 = vst.msk [vmem:[%s5109_s25 + $0xd8] sm:$0xff] %vm3177_vm5, %v3172_v8  ;;  %v3104_v27 = vmul.f32 %v3664_v5, %v5083_v36  ;;  %v3052_v60 = vpop.f32.mrb[81].mxu1 }
 0x2ef   : > { %3203 = vst.msk [vmem:[%s5109_s25 + $0xc8] sm:$0xff] %vm3177_vm5, %v3170_v20  ;;  %v3102_v56 = vmul.f32 %v5083_v36, %v3052_v60  ;;  %v3665_v19 = vpop.f32.mrb[82].mxu1 }
 0x2f0   : > { %v3143_v12 = vadd.f32 %v5095_v23, %v3104_v27  ;;  %v3105_v32 = vmul.f32 %v3665_v19, %v5083_v36  ;;  %v3055_v17 = vpop.f32.mrb[83].mxu1 }
 0x2f1   : > { %v3141_v46 = vadd.f32 %v5095_v23, %v3102_v56  ;;  %v3103_v0 = vmul.f32 %v5083_v36, %v3055_v17 }
 0x2f2   : > { %v3175_v6 = vadd.f32 %v3143_v12, %v2801_v25  ;;  %v3144_v29 = vadd.f32 %v5095_v23, %v3105_v32 }
 0x2f3   : > { %v3173_v1 = vadd.f32 %v3141_v46, %v2799_v49  ;;  %v3142_v34 = vadd.f32 %v5095_v23, %v3103_v0 }
 0x2f4   : > { %3208 = vst.msk [vmem:[%s5109_s25 + $0xf0] sm:$0xff] %vm3177_vm5, %v3175_v6  ;;  %v3176_v51 = vadd.f32 %v3144_v29, %v2802_v31 }
 0x2f5   : > { %3206 = vst.msk [vmem:[%s5109_s25 + $0xe0] sm:$0xff] %vm3177_vm5, %v3173_v1  ;;  %v3174_v63 = vadd.f32 %v3142_v34, %v2800_v39 }
 0x2f6   : > { %3209 = vst.msk [vmem:[%s5109_s25 + $0xf8] sm:$0xff] %vm3177_vm5, %v3176_v51 }
 0x2f7   : > { %3207 = vst.msk [vmem:[%s5109_s25 + $0xe8] sm:$0xff] %vm3177_vm5, %v3174_v63 }
 0x2f8 PF: > { %s23_s27 = sadd.s32 1, %s3734_s27   ;;  %s5341_s25 = smov %s3730_s26 }
 0x2f9   : > { %p20_p5 = scmp.ge.s32.totalorder %s23_s27, 4   ;;  %s5342_s26 = smov %s5344_s28 }
 0x2fb   :  { %22 = sbr.rel (!%p20_p5) target bundleno = 2 (0x2), region = 106 }

</bundles_post_ra>
